<compile_context>
chip_gen: v7x
topology: tpu7x:2x2x1
jax: 0.10.0
libtpu: 0.0.40
codegen_flags: <defaults>
</compile_context>

<pallas_src>
import math
import jax
import jax.numpy as jnp
import numpy as np
from jax.experimental import pallas as pl
from jax.experimental.pallas import tpu as pltpu

B_J0 = 0.01   # initial adaptation variable b
BETA = 1.8    # isAdapt=1 branch
R_M = 1.0
DT = 1.0
LANE = 128
# NOTE: ActFun_adp's gaussian surrogate only affects the backward pass; the forward is a
# hard threshold (input > 0).float().


def _make_kernel(T, Bb, last_only):
    """Single-invocation-per-batch-block ALIF recurrence; T unrolled at trace time."""

    def kernel(x_ref,                 # (T*Bb, D_in) bf16 — all time steps of this batch block
               w_i2h_ref, b_in_ref,   # (D_in, H1) bf16, (1, H1) f32  (b_in = b_i2h + b_h2h)
               w_h2h_ref,             # (H1, H1) bf16
               w_h2d_ref, b_h2d_ref,  # (H1, H2) bf16, (1, H2) f32
               w_d2o_ref, b_d2o_ref,  # (H2, O_pad) bf16, (1, O_pad) f32
               a1_ref, ro1_ref, omr1_ref,   # (1, H1) f32 loop-invariant decay factors
               a2_ref, ro2_ref, omr2_ref,   # (1, H2) f32
               init_r1_ref, init_r2_ref,    # (Bb, H1), (Bb, H2) f32
               out_ref,               # (Bb, O_pad) if last_only else (T*Bb, O_pad), f32
               *scratch):             # (T*Bb, H2) bf16 spike stash iff not last_only
        H1 = w_i2h_ref.shape[1]
        H2 = w_h2d_ref.shape[1]

        # One MXU push projects every time step through i2h (fused i2h+h2h bias).
        x_proj = (jnp.dot(x_ref[...], w_i2h_ref[...],
                          preferred_element_type=jnp.float32)
                  + b_in_ref[...])                          # (T*Bb, H1) f32

        w_h2h = w_h2h_ref[...]
        w_h2d = w_h2d_ref[...]

        # Hoist ALL (1,H) -> (Bb,H) broadcasts out of the unrolled loop.
        alpha1 = jnp.broadcast_to(a1_ref[...], (Bb, H1))
        ro1 = jnp.broadcast_to(ro1_ref[...], (Bb, H1))
        omr1 = jnp.broadcast_to(omr1_ref[...], (Bb, H1))
        alpha2 = jnp.broadcast_to(a2_ref[...], (Bb, H2))
        ro2 = jnp.broadcast_to(ro2_ref[...], (Bb, H2))
        omr2 = jnp.broadcast_to(omr2_ref[...], (Bb, H2))
        b_h2d = jnp.broadcast_to(b_h2d_ref[...], (Bb, H2))

        # PyTorch: r1_mem = r1_spike = torch.rand(B, H1); b starts at b_j0 (scalar).
        r1_mem = init_r1_ref[...]
        r1_spk = r1_mem
        b_r1 = jnp.full((Bb, H1), B_J0, jnp.float32)
        r2_mem = init_r2_ref[...]
        r2_spk = r2_mem
        b_r2 = jnp.full((Bb, H2), B_J0, jnp.float32)

        spk_stash = None if last_only else scratch[0]

        # Fully unrolled recurrence (static T, static sublane-aligned slices).
        for t in range(T):
            # h_input = i2h(x_t) + h2h(r1_spike)  (i2h precomputed above)
            h_in = (x_proj[t * Bb:(t + 1) * Bb]
                    + jnp.dot(r1_spk.astype(jnp.bfloat16), w_h2h,
                              preferred_element_type=jnp.float32))

            # ----- layer 1 ALIF update (mem_update_adp, isAdapt=1) -----
            b_r1 = ro1 * b_r1 + omr1 * r1_spk
            B1 = 0.3 + BETA * b_r1
            r1_mem = r1_mem * alpha1 + R_M * h_in - B1 * r1_spk * DT
            r1_spk = (r1_mem - B1 > 0).astype(jnp.float32)   # ActFun_adp fwd: gt(0)

            # d_input = h2d(r1_spike)
            d_in = (jnp.dot(r1_spk.astype(jnp.bfloat16), w_h2d,
                            preferred_element_type=jnp.float32) + b_h2d)

            # ----- layer 2 ALIF update -----
            b_r2 = ro2 * b_r2 + omr2 * r2_spk
            B2 = 0.3 + BETA * b_r2
            r2_mem = r2_mem * alpha2 + R_M * d_in - B2 * r2_spk * DT
            r2_spk = (r2_mem - B2 > 0).astype(jnp.float32)

            if not last_only:
                # Stash spikes; defer d2o matmul + store to after the recurrence.
                spk_stash[t * Bb:(t + 1) * Bb, :] = r2_spk.astype(jnp.bfloat16)

        w_d2o = w_d2o_ref[...]
        b_d2o = b_d2o_ref[...]
        if last_only:
            # 'duration' / 'interval': only the last step's d2o is ever used.
            out_ref[...] = (jnp.dot(r2_spk.astype(jnp.bfloat16), w_d2o,
                                    preferred_element_type=jnp.float32) + b_d2o)
        else:
            # 'syn' / 'recall': one off-critical-path matmul + one lane-dense store.
            out_ref[...] = (jnp.dot(spk_stash[...], w_d2o,
                                    preferred_element_type=jnp.float32) + b_d2o)

    return kernel


def rnn_custom_forward(x, params, init_r1, init_r2, task='duration'):
    """x: (batch, input_size, time_window) float32 — see layout comment above."""
    B, D_in, T = x.shape
    H1 = params['w_i2h'].shape[1]
    H2 = params['w_h2d'].shape[1]
    O = params['w_d2o'].shape[1]
    last_only = task in ('duration', 'interval')

    # Pad output/lane dimension to 128 -> unmasked stores; sliced back below.
    O_pad = max(LANE, ((O + LANE - 1) // LANE) * LANE)

    # Batch (sublane) padding + blocking.  Two blocks when padded batch >= 16 so v7x's
    # two TensorCores can each take half (dimension_semantics=("parallel",)).
    if B > 8:
        B_pad = ((B + 15) // 16) * 16
        nb, Bb = 2, ((B + 15) // 16) * 16 // 2
    else:
        B_pad, nb, Bb = 8, 1, 8

    bf = jnp.bfloat16

    # (B, D_in, T) -> (nb, T*Bb, D_in), batch-padded, bf16 matmul operand.
    x_t = jnp.transpose(x, (2, 0, 1)).astype(jnp.float32)       # (T, B, D_in)
    r1_0 = init_r1.astype(jnp.float32)
    r2_0 = init_r2.astype(jnp.float32)
    if B_pad != B:
        x_t = jnp.pad(x_t, ((0, 0), (0, B_pad - B), (0, 0)))
        r1_0 = jnp.pad(r1_0, ((0, B_pad - B), (0, 0)))
        r2_0 = jnp.pad(r2_0, ((0, B_pad - B), (0, 0)))
    x_blk = (x_t.astype(bf)
             .reshape(T, nb, Bb, D_in)
             .transpose(1, 0, 2, 3)
             .reshape(nb, T * Bb, D_in))
    r1_0 = r1_0.reshape(nb, Bb, H1)
    r2_0 = r2_0.reshape(nb, Bb, H2)

    # Weights as bf16 MXU operands; biases stay f32; d2o padded to O_pad lanes.
    w_i2h = params['w_i2h'].astype(bf)
    w_h2h = params['w_h2h'].astype(bf)
    w_h2d = params['w_h2d'].astype(bf)
    w_d2o = params['w_d2o']
    b_d2o = params['b_d2o']
    if O_pad != O:
        w_d2o = jnp.pad(w_d2o, ((0, 0), (0, O_pad - O)))
        b_d2o = jnp.pad(b_d2o, ((0, 0), (0, O_pad - O)))
    w_d2o = w_d2o.astype(bf)
    b_in = (params['b_i2h'] + params['b_h2h']).astype(jnp.float32)
    b_h2d = params['b_h2d'].astype(jnp.float32)
    b_d2o = b_d2o.astype(jnp.float32)

    # Loop-invariant decay factors (and 1-ro) computed once, not per step.
    alpha1 = jnp.exp(-DT / params['tau_m_r1'])
    ro1 = jnp.exp(-DT / params['tau_adp_r1'])
    omr1 = 1.0 - ro1
    alpha2 = jnp.exp(-DT / params['tau_m_r2'])
    ro2 = jnp.exp(-DT / params['tau_adp_r2'])
    omr2 = 1.0 - ro2

    def rep(shape):  # replicated (block == full array) spec
        zeros = (0,) * len(shape)
        return pl.BlockSpec(shape, lambda b, _z=zeros: _z)

    in_specs = [
        pl.BlockSpec((None, T * Bb, D_in), lambda b: (b, 0, 0)),   # per-batch-block input
        rep((D_in, H1)), rep((1, H1)),                             # i2h weight, fused bias
        rep((H1, H1)),                                             # h2h weight
        rep((H1, H2)), rep((1, H2)),                               # h2d
        rep((H2, O_pad)), rep((1, O_pad)),                         # d2o (lane-padded)
        rep((1, H1)), rep((1, H1)), rep((1, H1)),                  # alpha1, ro1, 1-ro1
        rep((1, H2)), rep((1, H2)), rep((1, H2)),                  # alpha2, ro2, 1-ro2
        pl.BlockSpec((None, Bb, H1), lambda b: (b, 0, 0)),         # init state r1
        pl.BlockSpec((None, Bb, H2), lambda b: (b, 0, 0)),         # init state r2
    ]

    if last_only:
        out_shape = jax.ShapeDtypeStruct((nb, Bb, O_pad), jnp.float32)
        out_spec = pl.BlockSpec((None, Bb, O_pad), lambda b: (b, 0, 0))
        scratch_shapes = ()
    else:
        out_shape = jax.ShapeDtypeStruct((nb, T * Bb, O_pad), jnp.float32)
        out_spec = pl.BlockSpec((None, T * Bb, O_pad), lambda b: (b, 0, 0))
        scratch_shapes = (pltpu.VMEM((T * Bb, H2), jnp.bfloat16),)   # r2_spike stash

    grid_spec = pltpu.PrefetchScalarGridSpec(
        num_scalar_prefetch=0,
        grid=(nb,),
        in_specs=in_specs,
        out_specs=out_spec,
        scratch_shapes=scratch_shapes,
    )

    out = pl.pallas_call(
        _make_kernel(T, Bb, last_only),
        out_shape=out_shape,
        grid_spec=grid_spec,
        compiler_params=pltpu.CompilerParams(dimension_semantics=("parallel",)),
    )(x_blk,
      w_i2h, b_in, w_h2h,
      w_h2d, b_h2d, w_d2o, b_d2o,
      alpha1, ro1, omr1, alpha2, ro2, omr2,
      r1_0, r2_0)

    if last_only:
        # (nb, Bb, O_pad) -> (B, O) == output[:, :, -1]
        return out.reshape(nb * Bb, O_pad)[:B, :O]
    # 'syn' / 'recall': (nb, T*Bb, O_pad) -> (B, O, T) == torch.stack(out, dim=2)
    out = (out.reshape(nb, T, Bb, O_pad)
           .transpose(1, 0, 2, 3)
           .reshape(T, nb * Bb, O_pad))[:, :B, :O]
    return jnp.transpose(out, (1, 2, 0))


# ----------------------- pure-JAX reference (for verification) -----------------------
def ref_forward(x, params, init_r1, init_r2, task='duration'):
    """Same algorithm; matmul operands bf16-rounded to match the kernel's MXU path."""
    B, D_in, T = x.shape
    hp = jax.lax.Precision.HIGHEST

    def q(a):  # bf16 round-trip (matches kernel operand precision)
        return a.astype(jnp.bfloat16).astype(jnp.float32)

    w_i2h = q(params['w_i2h']); w_h2h = q(params['w_h2h'])
    w_h2d = q(params['w_h2d']); w_d2o = q(params['w_d2o'])
    r1_mem = r1_spk = init_r1
    r2_mem = r2_spk = init_r2
    b1 = jnp.float32(B_J0)
    b2 = jnp.float32(B_J0)
    outs = []
    for i in range(T):
        x_t = q(x[:, :, i])
        h_in = (jnp.dot(x_t, w_i2h, precision=hp) + params['b_i2h']
                + jnp.dot(q(r1_spk), w_h2h, precision=hp) + params['b_h2h'])
        a1 = jnp.exp(-DT / params['tau_m_r1']); ro1 = jnp.exp(-DT / params['tau_adp_r1'])
        b1 = ro1 * b1 + (1 - ro1) * r1_spk
        B1 = 0.3 + BETA * b1
        r1_mem = r1_mem * a1 + R_M * h_in - B1 * r1_spk * DT
        r1_spk = (r1_mem - B1 > 0).astype(jnp.float32)
        d_in = jnp.dot(q(r1_spk), w_h2d, precision=hp) + params['b_h2d']
        a2 = jnp.exp(-DT / params['tau_m_r2']); ro2 = jnp.exp(-DT / params['tau_adp_r2'])
        b2 = ro2 * b2 + (1 - ro2) * r2_spk
        B2 = 0.3 + BETA * b2
        r2_mem = r2_mem * a2 + R_M * d_in - B2 * r2_spk * DT
        r2_spk = (r2_mem - B2 > 0).astype(jnp.float32)
        outs.append(jnp.dot(q(r2_spk), w_d2o, precision=hp) + params['b_d2o'])
    output = jnp.stack(outs, axis=2)
    if task in ('duration', 'interval'):
        return output[:, :, -1]
    return output


# ----------------------- deterministic parameter initialization -----------------------
def init_params(key, input_size, h1, h2, output_size):
    ks = jax.random.split(key, 8)

    def xavier(k, fan_in, fan_out):
        lim = math.sqrt(6.0 / (fan_in + fan_out))
        # stored already transposed: (fan_in, fan_out) so kernel does x @ W
        return jax.random.uniform(k, (fan_in, fan_out), jnp.float32, -lim, lim)

    def orthogonal(k, n):
        a = jax.random.normal(k, (n, n), jnp.float32)
        q, r = jnp.linalg.qr(a)
        q = q * jnp.sign(jnp.diag(r))
        return q.astype(jnp.float32)

    return {
        'w_i2h': xavier(ks[0], input_size, h1), 'b_i2h': jnp.zeros((1, h1), jnp.float32),
        'w_h2h': orthogonal(ks[1], h1),         'b_h2h': jnp.zeros((1, h1), jnp.float32),
        'w_h2d': xavier(ks[2], h1, h2),         'b_h2d': jnp.zeros((1, h2), jnp.float32),
        'w_d2o': xavier(ks[3], h2, output_size), 'b_d2o': jnp.zeros((1, output_size), jnp.float32),
        'tau_adp_r1': 700.0 + 25.0 * jax.random.normal(ks[4], (1, h1), jnp.float32),
        'tau_adp_r2': 700.0 + 25.0 * jax.random.normal(ks[5], (1, h2), jnp.float32),
        'tau_m_r1': 20.0 + 5.0 * jax.random.normal(ks[6], (1, h1), jnp.float32),
        'tau_m_r2': 20.0 + 5.0 * jax.random.normal(ks[7], (1, h2), jnp.float32),
    }


if __name__ == "__main__":
    batch = 4
    input_size = 16      # == seq_num in the PyTorch forward (axis fed to i2h)
    hidden_dims = [64, 64]
    output_size = 4
    time_window = 8

    key = jax.random.PRNGKey(0)
    k_x, k_p, k_r1, k_r2 = jax.random.split(key, 4)

    x = jax.random.normal(k_x, (batch, input_size, time_window), jnp.float32)
    params = init_params(k_p, input_size, hidden_dims[0], hidden_dims[1], output_size)
    # torch.rand initial membrane/spike state (deterministic stand-in); round-tripped
    # through bf16 so the kernel's bf16 operand cast of the step-0 spike is exact.
    init_r1 = jax.random.uniform(k_r1, (batch, hidden_dims[0]), jnp.float32
                                 ).astype(jnp.bfloat16).astype(jnp.float32)
    init_r2 = jax.random.uniform(k_r2, (batch, hidden_dims[1]), jnp.float32
                                 ).astype(jnp.bfloat16).astype(jnp.float32)

    # 'duration' path (last-step-only output, as in the PyTorch default task)
    out = rnn_custom_forward(x, params, init_r1, init_r2, task='duration')
    out = jax.block_until_ready(out)
    ref = ref_forward(x, params, init_r1, init_r2, task='duration')
    np.testing.assert_allclose(np.asarray(out), np.asarray(ref), rtol=2e-3, atol=2e-3)
    assert out.shape == (batch, output_size)

    # 'syn' path (full per-step output) exercised as well
    out_syn = rnn_custom_forward(x, params, init_r1, init_r2, task='syn')
    out_syn = jax.block_until_ready(out_syn)
    ref_syn = ref_forward(x, params, init_r1, init_r2, task='syn')
    np.testing.assert_allclose(np.asarray(out_syn), np.asarray(ref_syn), rtol=2e-3, atol=2e-3)
    assert out_syn.shape == (batch, output_size, time_window)

    print("KERNEL_OK")
</pallas_src>

<mosaic_0001>
module attributes {stable_mosaic.version = 11 : i64} {
  func.func @kernel(%arg0: i32, %arg1: memref<1x64x16xbf16, #tpu.memory_space<vmem>>, %arg2: memref<16x64xbf16, #tpu.memory_space<vmem>>, %arg3: memref<1x64xf32, #tpu.memory_space<vmem>>, %arg4: memref<64x64xbf16, #tpu.memory_space<vmem>>, %arg5: memref<64x64xbf16, #tpu.memory_space<vmem>>, %arg6: memref<1x64xf32, #tpu.memory_space<vmem>>, %arg7: memref<64x128xbf16, #tpu.memory_space<vmem>>, %arg8: memref<1x128xf32, #tpu.memory_space<vmem>>, %arg9: memref<1x64xf32, #tpu.memory_space<vmem>>, %arg10: memref<1x64xf32, #tpu.memory_space<vmem>>, %arg11: memref<1x64xf32, #tpu.memory_space<vmem>>, %arg12: memref<1x64xf32, #tpu.memory_space<vmem>>, %arg13: memref<1x64xf32, #tpu.memory_space<vmem>>, %arg14: memref<1x64xf32, #tpu.memory_space<vmem>>, %arg15: memref<1x8x64xf32, #tpu.memory_space<vmem>>, %arg16: memref<1x8x64xf32, #tpu.memory_space<vmem>>, %arg17: memref<1x8x128xf32, #tpu.memory_space<vmem>>) attributes {dimension_semantics = [#tpu.dimension_semantics<parallel>], iteration_bounds = array<i64: 1>, scalar_prefetch = 0 : i64, scratch_operands = 0 : i64, tpu.core_type = #tpu.core_type<tc>, window_params = [{transform_indices = @transform_0, window_bounds = array<i64: 1, 64, 16>}, {pipeline_mode = #tpu.pipeline_mode<synchronous>, transform_indices = @transform_1, window_bounds = array<i64: 16, 64>}, {pipeline_mode = #tpu.pipeline_mode<synchronous>, transform_indices = @transform_2, window_bounds = array<i64: 1, 64>}, {pipeline_mode = #tpu.pipeline_mode<synchronous>, transform_indices = @transform_3, window_bounds = array<i64: 64, 64>}, {pipeline_mode = #tpu.pipeline_mode<synchronous>, transform_indices = @transform_4, window_bounds = array<i64: 64, 64>}, {pipeline_mode = #tpu.pipeline_mode<synchronous>, transform_indices = @transform_5, window_bounds = array<i64: 1, 64>}, {pipeline_mode = #tpu.pipeline_mode<synchronous>, transform_indices = @transform_6, window_bounds = array<i64: 64, 128>}, {pipeline_mode = #tpu.pipeline_mode<synchronous>, transform_indices = @transform_7, window_bounds = array<i64: 1, 128>}, {pipeline_mode = #tpu.pipeline_mode<synchronous>, transform_indices = @transform_8, window_bounds = array<i64: 1, 64>}, {pipeline_mode = #tpu.pipeline_mode<synchronous>, transform_indices = @transform_9, window_bounds = array<i64: 1, 64>}, {pipeline_mode = #tpu.pipeline_mode<synchronous>, transform_indices = @transform_10, window_bounds = array<i64: 1, 64>}, {pipeline_mode = #tpu.pipeline_mode<synchronous>, transform_indices = @transform_11, window_bounds = array<i64: 1, 64>}, {pipeline_mode = #tpu.pipeline_mode<synchronous>, transform_indices = @transform_12, window_bounds = array<i64: 1, 64>}, {pipeline_mode = #tpu.pipeline_mode<synchronous>, transform_indices = @transform_13, window_bounds = array<i64: 1, 64>}, {transform_indices = @transform_14, window_bounds = array<i64: 1, 8, 64>}, {transform_indices = @transform_15, window_bounds = array<i64: 1, 8, 64>}, {transform_indices = @transform_16, window_bounds = array<i64: 1, 8, 128>}]} {
    %c0 = arith.constant 0 : index
    %c0_0 = arith.constant 0 : index
    %c0_1 = arith.constant 0 : index
    %0 = vector.load %arg1[%c0, %c0_0, %c0_1] : memref<1x64x16xbf16, #tpu.memory_space<vmem>>, vector<1x64x16xbf16>
    %1 = vector.shape_cast %0 : vector<1x64x16xbf16> to vector<64x16xbf16>
    %c0_2 = arith.constant 0 : index
    %c0_3 = arith.constant 0 : index
    %2 = vector.load %arg2[%c0_2, %c0_3] : memref<16x64xbf16, #tpu.memory_space<vmem>>, vector<16x64xbf16>
    %cst = arith.constant dense<0.000000e+00> : vector<64x64xf32>
    %3 = tpu.matmul %1, %2, %cst {dimension_numbers = #tpu.dot_dimension_numbers<[1], [0], [0], [1], [0, 0, 1, 1], [], []>} : vector<64x16xbf16>, vector<16x64xbf16>, vector<64x64xf32> -> vector<64x64xf32>
    %c0_4 = arith.constant 0 : index
    %c0_5 = arith.constant 0 : index
    %4 = vector.load %arg3[%c0_4, %c0_5] : memref<1x64xf32, #tpu.memory_space<vmem>>, vector<1x64xf32>
    %5 = vector.broadcast %4 : vector<1x64xf32> to vector<64x64xf32>
    %6 = arith.addf %3, %5 : vector<64x64xf32>
    %c0_6 = arith.constant 0 : index
    %c0_7 = arith.constant 0 : index
    %7 = vector.load %arg4[%c0_6, %c0_7] : memref<64x64xbf16, #tpu.memory_space<vmem>>, vector<64x64xbf16>
    %c0_8 = arith.constant 0 : index
    %c0_9 = arith.constant 0 : index
    %8 = vector.load %arg5[%c0_8, %c0_9] : memref<64x64xbf16, #tpu.memory_space<vmem>>, vector<64x64xbf16>
    %c0_10 = arith.constant 0 : index
    %c0_11 = arith.constant 0 : index
    %9 = vector.load %arg9[%c0_10, %c0_11] : memref<1x64xf32, #tpu.memory_space<vmem>>, vector<1x64xf32>
    %10 = vector.shape_cast %9 : vector<1x64xf32> to vector<1x64xf32>
    %11 = vector.broadcast %10 : vector<1x64xf32> to vector<8x64xf32>
    %c0_12 = arith.constant 0 : index
    %c0_13 = arith.constant 0 : index
    %12 = vector.load %arg10[%c0_12, %c0_13] : memref<1x64xf32, #tpu.memory_space<vmem>>, vector<1x64xf32>
    %13 = vector.shape_cast %12 : vector<1x64xf32> to vector<1x64xf32>
    %14 = vector.broadcast %13 : vector<1x64xf32> to vector<8x64xf32>
    %c0_14 = arith.constant 0 : index
    %c0_15 = arith.constant 0 : index
    %15 = vector.load %arg11[%c0_14, %c0_15] : memref<1x64xf32, #tpu.memory_space<vmem>>, vector<1x64xf32>
    %16 = vector.shape_cast %15 : vector<1x64xf32> to vector<1x64xf32>
    %17 = vector.broadcast %16 : vector<1x64xf32> to vector<8x64xf32>
    %c0_16 = arith.constant 0 : index
    %c0_17 = arith.constant 0 : index
    %18 = vector.load %arg12[%c0_16, %c0_17] : memref<1x64xf32, #tpu.memory_space<vmem>>, vector<1x64xf32>
    %19 = vector.shape_cast %18 : vector<1x64xf32> to vector<1x64xf32>
    %20 = vector.broadcast %19 : vector<1x64xf32> to vector<8x64xf32>
    %c0_18 = arith.constant 0 : index
    %c0_19 = arith.constant 0 : index
    %21 = vector.load %arg13[%c0_18, %c0_19] : memref<1x64xf32, #tpu.memory_space<vmem>>, vector<1x64xf32>
    %22 = vector.shape_cast %21 : vector<1x64xf32> to vector<1x64xf32>
    %23 = vector.broadcast %22 : vector<1x64xf32> to vector<8x64xf32>
    %c0_20 = arith.constant 0 : index
    %c0_21 = arith.constant 0 : index
    %24 = vector.load %arg14[%c0_20, %c0_21] : memref<1x64xf32, #tpu.memory_space<vmem>>, vector<1x64xf32>
    %25 = vector.shape_cast %24 : vector<1x64xf32> to vector<1x64xf32>
    %26 = vector.broadcast %25 : vector<1x64xf32> to vector<8x64xf32>
    %c0_22 = arith.constant 0 : index
    %c0_23 = arith.constant 0 : index
    %27 = vector.load %arg6[%c0_22, %c0_23] : memref<1x64xf32, #tpu.memory_space<vmem>>, vector<1x64xf32>
    %28 = vector.shape_cast %27 : vector<1x64xf32> to vector<1x64xf32>
    %29 = vector.broadcast %28 : vector<1x64xf32> to vector<8x64xf32>
    %c0_24 = arith.constant 0 : index
    %c0_25 = arith.constant 0 : index
    %c0_26 = arith.constant 0 : index
    %30 = vector.load %arg15[%c0_24, %c0_25, %c0_26] : memref<1x8x64xf32, #tpu.memory_space<vmem>>, vector<1x8x64xf32>
    %31 = vector.shape_cast %30 : vector<1x8x64xf32> to vector<8x64xf32>
    %cst_27 = arith.constant 0.00999999977 : f32
    %32 = vector.broadcast %cst_27 : f32 to vector<8x64xf32>
    %c0_28 = arith.constant 0 : index
    %c0_29 = arith.constant 0 : index
    %c0_30 = arith.constant 0 : index
    %33 = vector.load %arg16[%c0_28, %c0_29, %c0_30] : memref<1x8x64xf32, #tpu.memory_space<vmem>>, vector<1x8x64xf32>
    %34 = vector.shape_cast %33 : vector<1x8x64xf32> to vector<8x64xf32>
    %cst_31 = arith.constant 0.00999999977 : f32
    %35 = vector.broadcast %cst_31 : f32 to vector<8x64xf32>
    %36 = vector.extract_strided_slice %6 {offsets = [0, 0], sizes = [8, 64], strides = [1, 1]} : vector<64x64xf32> to vector<8x64xf32>
    %37 = arith.truncf %31 : vector<8x64xf32> to vector<8x64xbf16>
    %cst_32 = arith.constant dense<0.000000e+00> : vector<8x64xf32>
    %38 = tpu.matmul %37, %7, %cst_32 {dimension_numbers = #tpu.dot_dimension_numbers<[1], [0], [0], [1], [0, 0, 1, 1], [], []>} : vector<8x64xbf16>, vector<64x64xbf16>, vector<8x64xf32> -> vector<8x64xf32>
    %39 = arith.addf %36, %38 : vector<8x64xf32>
    %40 = arith.mulf %14, %32 : vector<8x64xf32>
    %41 = arith.mulf %17, %31 : vector<8x64xf32>
    %42 = arith.addf %40, %41 : vector<8x64xf32>
    %cst_33 = arith.constant 1.800000e+00 : f32
    %43 = vector.broadcast %cst_33 : f32 to vector<8x64xf32>
    %44 = arith.mulf %43, %42 : vector<8x64xf32>
    %cst_34 = arith.constant 3.000000e-01 : f32
    %45 = vector.broadcast %cst_34 : f32 to vector<8x64xf32>
    %46 = arith.addf %45, %44 : vector<8x64xf32>
    %47 = arith.mulf %31, %11 : vector<8x64xf32>
    %cst_35 = arith.constant 1.000000e+00 : f32
    %48 = vector.broadcast %cst_35 : f32 to vector<8x64xf32>
    %49 = arith.mulf %48, %39 : vector<8x64xf32>
    %50 = arith.addf %47, %49 : vector<8x64xf32>
    %51 = arith.mulf %46, %31 : vector<8x64xf32>
    %cst_36 = arith.constant 1.000000e+00 : f32
    %52 = vector.broadcast %cst_36 : f32 to vector<8x64xf32>
    %53 = arith.mulf %51, %52 : vector<8x64xf32>
    %54 = arith.subf %50, %53 : vector<8x64xf32>
    %55 = arith.subf %54, %46 : vector<8x64xf32>
    %cst_37 = arith.constant 0.000000e+00 : f32
    %56 = vector.broadcast %cst_37 : f32 to vector<8x64xf32>
    %57 = arith.cmpf ogt, %55, %56 : vector<8x64xf32>
    %58 = arith.extui %57 : vector<8x64xi1> to vector<8x64xi32>
    %59 = arith.sitofp %58 : vector<8x64xi32> to vector<8x64xf32>
    %60 = arith.truncf %59 : vector<8x64xf32> to vector<8x64xbf16>
    %cst_38 = arith.constant dense<0.000000e+00> : vector<8x64xf32>
    %61 = tpu.matmul %60, %8, %cst_38 {dimension_numbers = #tpu.dot_dimension_numbers<[1], [0], [0], [1], [0, 0, 1, 1], [], []>} : vector<8x64xbf16>, vector<64x64xbf16>, vector<8x64xf32> -> vector<8x64xf32>
    %62 = arith.addf %61, %29 : vector<8x64xf32>
    %63 = arith.mulf %23, %35 : vector<8x64xf32>
    %64 = arith.mulf %26, %34 : vector<8x64xf32>
    %65 = arith.addf %63, %64 : vector<8x64xf32>
    %cst_39 = arith.constant 1.800000e+00 : f32
    %66 = vector.broadcast %cst_39 : f32 to vector<8x64xf32>
    %67 = arith.mulf %66, %65 : vector<8x64xf32>
    %cst_40 = arith.constant 3.000000e-01 : f32
    %68 = vector.broadcast %cst_40 : f32 to vector<8x64xf32>
    %69 = arith.addf %68, %67 : vector<8x64xf32>
    %70 = arith.mulf %34, %20 : vector<8x64xf32>
    %cst_41 = arith.constant 1.000000e+00 : f32
    %71 = vector.broadcast %cst_41 : f32 to vector<8x64xf32>
    %72 = arith.mulf %71, %62 : vector<8x64xf32>
    %73 = arith.addf %70, %72 : vector<8x64xf32>
    %74 = arith.mulf %69, %34 : vector<8x64xf32>
    %cst_42 = arith.constant 1.000000e+00 : f32
    %75 = vector.broadcast %cst_42 : f32 to vector<8x64xf32>
    %76 = arith.mulf %74, %75 : vector<8x64xf32>
    %77 = arith.subf %73, %76 : vector<8x64xf32>
    %78 = arith.subf %77, %69 : vector<8x64xf32>
    %cst_43 = arith.constant 0.000000e+00 : f32
    %79 = vector.broadcast %cst_43 : f32 to vector<8x64xf32>
    %80 = arith.cmpf ogt, %78, %79 : vector<8x64xf32>
    %81 = arith.extui %80 : vector<8x64xi1> to vector<8x64xi32>
    %82 = arith.sitofp %81 : vector<8x64xi32> to vector<8x64xf32>
    %83 = vector.extract_strided_slice %6 {offsets = [8, 0], sizes = [8, 64], strides = [1, 1]} : vector<64x64xf32> to vector<8x64xf32>
    %84 = arith.truncf %59 : vector<8x64xf32> to vector<8x64xbf16>
    %cst_44 = arith.constant dense<0.000000e+00> : vector<8x64xf32>
    %85 = tpu.matmul %84, %7, %cst_44 {dimension_numbers = #tpu.dot_dimension_numbers<[1], [0], [0], [1], [0, 0, 1, 1], [], []>} : vector<8x64xbf16>, vector<64x64xbf16>, vector<8x64xf32> -> vector<8x64xf32>
    %86 = arith.addf %83, %85 : vector<8x64xf32>
    %87 = arith.mulf %14, %42 : vector<8x64xf32>
    %88 = arith.mulf %17, %59 : vector<8x64xf32>
    %89 = arith.addf %87, %88 : vector<8x64xf32>
    %cst_45 = arith.constant 1.800000e+00 : f32
    %90 = vector.broadcast %cst_45 : f32 to vector<8x64xf32>
    %91 = arith.mulf %90, %89 : vector<8x64xf32>
    %cst_46 = arith.constant 3.000000e-01 : f32
    %92 = vector.broadcast %cst_46 : f32 to vector<8x64xf32>
    %93 = arith.addf %92, %91 : vector<8x64xf32>
    %94 = arith.mulf %54, %11 : vector<8x64xf32>
    %cst_47 = arith.constant 1.000000e+00 : f32
    %95 = vector.broadcast %cst_47 : f32 to vector<8x64xf32>
    %96 = arith.mulf %95, %86 : vector<8x64xf32>
    %97 = arith.addf %94, %96 : vector<8x64xf32>
    %98 = arith.mulf %93, %59 : vector<8x64xf32>
    %cst_48 = arith.constant 1.000000e+00 : f32
    %99 = vector.broadcast %cst_48 : f32 to vector<8x64xf32>
    %100 = arith.mulf %98, %99 : vector<8x64xf32>
    %101 = arith.subf %97, %100 : vector<8x64xf32>
    %102 = arith.subf %101, %93 : vector<8x64xf32>
    %cst_49 = arith.constant 0.000000e+00 : f32
    %103 = vector.broadcast %cst_49 : f32 to vector<8x64xf32>
    %104 = arith.cmpf ogt, %102, %103 : vector<8x64xf32>
    %105 = arith.extui %104 : vector<8x64xi1> to vector<8x64xi32>
    %106 = arith.sitofp %105 : vector<8x64xi32> to vector<8x64xf32>
    %107 = arith.truncf %106 : vector<8x64xf32> to vector<8x64xbf16>
    %cst_50 = arith.constant dense<0.000000e+00> : vector<8x64xf32>
    %108 = tpu.matmul %107, %8, %cst_50 {dimension_numbers = #tpu.dot_dimension_numbers<[1], [0], [0], [1], [0, 0, 1, 1], [], []>} : vector<8x64xbf16>, vector<64x64xbf16>, vector<8x64xf32> -> vector<8x64xf32>
    %109 = arith.addf %108, %29 : vector<8x64xf32>
    %110 = arith.mulf %23, %65 : vector<8x64xf32>
    %111 = arith.mulf %26, %82 : vector<8x64xf32>
    %112 = arith.addf %110, %111 : vector<8x64xf32>
    %cst_51 = arith.constant 1.800000e+00 : f32
    %113 = vector.broadcast %cst_51 : f32 to vector<8x64xf32>
    %114 = arith.mulf %113, %112 : vector<8x64xf32>
    %cst_52 = arith.constant 3.000000e-01 : f32
    %115 = vector.broadcast %cst_52 : f32 to vector<8x64xf32>
    %116 = arith.addf %115, %114 : vector<8x64xf32>
    %117 = arith.mulf %77, %20 : vector<8x64xf32>
    %cst_53 = arith.constant 1.000000e+00 : f32
    %118 = vector.broadcast %cst_53 : f32 to vector<8x64xf32>
    %119 = arith.mulf %118, %109 : vector<8x64xf32>
    %120 = arith.addf %117, %119 : vector<8x64xf32>
    %121 = arith.mulf %116, %82 : vector<8x64xf32>
    %cst_54 = arith.constant 1.000000e+00 : f32
    %122 = vector.broadcast %cst_54 : f32 to vector<8x64xf32>
    %123 = arith.mulf %121, %122 : vector<8x64xf32>
    %124 = arith.subf %120, %123 : vector<8x64xf32>
    %125 = arith.subf %124, %116 : vector<8x64xf32>
    %cst_55 = arith.constant 0.000000e+00 : f32
    %126 = vector.broadcast %cst_55 : f32 to vector<8x64xf32>
    %127 = arith.cmpf ogt, %125, %126 : vector<8x64xf32>
    %128 = arith.extui %127 : vector<8x64xi1> to vector<8x64xi32>
    %129 = arith.sitofp %128 : vector<8x64xi32> to vector<8x64xf32>
    %130 = vector.extract_strided_slice %6 {offsets = [16, 0], sizes = [8, 64], strides = [1, 1]} : vector<64x64xf32> to vector<8x64xf32>
    %131 = arith.truncf %106 : vector<8x64xf32> to vector<8x64xbf16>
    %cst_56 = arith.constant dense<0.000000e+00> : vector<8x64xf32>
    %132 = tpu.matmul %131, %7, %cst_56 {dimension_numbers = #tpu.dot_dimension_numbers<[1], [0], [0], [1], [0, 0, 1, 1], [], []>} : vector<8x64xbf16>, vector<64x64xbf16>, vector<8x64xf32> -> vector<8x64xf32>
    %133 = arith.addf %130, %132 : vector<8x64xf32>
    %134 = arith.mulf %14, %89 : vector<8x64xf32>
    %135 = arith.mulf %17, %106 : vector<8x64xf32>
    %136 = arith.addf %134, %135 : vector<8x64xf32>
    %cst_57 = arith.constant 1.800000e+00 : f32
    %137 = vector.broadcast %cst_57 : f32 to vector<8x64xf32>
    %138 = arith.mulf %137, %136 : vector<8x64xf32>
    %cst_58 = arith.constant 3.000000e-01 : f32
    %139 = vector.broadcast %cst_58 : f32 to vector<8x64xf32>
    %140 = arith.addf %139, %138 : vector<8x64xf32>
    %141 = arith.mulf %101, %11 : vector<8x64xf32>
    %cst_59 = arith.constant 1.000000e+00 : f32
    %142 = vector.broadcast %cst_59 : f32 to vector<8x64xf32>
    %143 = arith.mulf %142, %133 : vector<8x64xf32>
    %144 = arith.addf %141, %143 : vector<8x64xf32>
    %145 = arith.mulf %140, %106 : vector<8x64xf32>
    %cst_60 = arith.constant 1.000000e+00 : f32
    %146 = vector.broadcast %cst_60 : f32 to vector<8x64xf32>
    %147 = arith.mulf %145, %146 : vector<8x64xf32>
    %148 = arith.subf %144, %147 : vector<8x64xf32>
    %149 = arith.subf %148, %140 : vector<8x64xf32>
    %cst_61 = arith.constant 0.000000e+00 : f32
    %150 = vector.broadcast %cst_61 : f32 to vector<8x64xf32>
    %151 = arith.cmpf ogt, %149, %150 : vector<8x64xf32>
    %152 = arith.extui %151 : vector<8x64xi1> to vector<8x64xi32>
    %153 = arith.sitofp %152 : vector<8x64xi32> to vector<8x64xf32>
    %154 = arith.truncf %153 : vector<8x64xf32> to vector<8x64xbf16>
    %cst_62 = arith.constant dense<0.000000e+00> : vector<8x64xf32>
    %155 = tpu.matmul %154, %8, %cst_62 {dimension_numbers = #tpu.dot_dimension_numbers<[1], [0], [0], [1], [0, 0, 1, 1], [], []>} : vector<8x64xbf16>, vector<64x64xbf16>, vector<8x64xf32> -> vector<8x64xf32>
    %156 = arith.addf %155, %29 : vector<8x64xf32>
    %157 = arith.mulf %23, %112 : vector<8x64xf32>
    %158 = arith.mulf %26, %129 : vector<8x64xf32>
    %159 = arith.addf %157, %158 : vector<8x64xf32>
    %cst_63 = arith.constant 1.800000e+00 : f32
    %160 = vector.broadcast %cst_63 : f32 to vector<8x64xf32>
    %161 = arith.mulf %160, %159 : vector<8x64xf32>
    %cst_64 = arith.constant 3.000000e-01 : f32
    %162 = vector.broadcast %cst_64 : f32 to vector<8x64xf32>
    %163 = arith.addf %162, %161 : vector<8x64xf32>
    %164 = arith.mulf %124, %20 : vector<8x64xf32>
    %cst_65 = arith.constant 1.000000e+00 : f32
    %165 = vector.broadcast %cst_65 : f32 to vector<8x64xf32>
    %166 = arith.mulf %165, %156 : vector<8x64xf32>
    %167 = arith.addf %164, %166 : vector<8x64xf32>
    %168 = arith.mulf %163, %129 : vector<8x64xf32>
    %cst_66 = arith.constant 1.000000e+00 : f32
    %169 = vector.broadcast %cst_66 : f32 to vector<8x64xf32>
    %170 = arith.mulf %168, %169 : vector<8x64xf32>
    %171 = arith.subf %167, %170 : vector<8x64xf32>
    %172 = arith.subf %171, %163 : vector<8x64xf32>
    %cst_67 = arith.constant 0.000000e+00 : f32
    %173 = vector.broadcast %cst_67 : f32 to vector<8x64xf32>
    %174 = arith.cmpf ogt, %172, %173 : vector<8x64xf32>
    %175 = arith.extui %174 : vector<8x64xi1> to vector<8x64xi32>
    %176 = arith.sitofp %175 : vector<8x64xi32> to vector<8x64xf32>
    %177 = vector.extract_strided_slice %6 {offsets = [24, 0], sizes = [8, 64], strides = [1, 1]} : vector<64x64xf32> to vector<8x64xf32>
    %178 = arith.truncf %153 : vector<8x64xf32> to vector<8x64xbf16>
    %cst_68 = arith.constant dense<0.000000e+00> : vector<8x64xf32>
    %179 = tpu.matmul %178, %7, %cst_68 {dimension_numbers = #tpu.dot_dimension_numbers<[1], [0], [0], [1], [0, 0, 1, 1], [], []>} : vector<8x64xbf16>, vector<64x64xbf16>, vector<8x64xf32> -> vector<8x64xf32>
    %180 = arith.addf %177, %179 : vector<8x64xf32>
    %181 = arith.mulf %14, %136 : vector<8x64xf32>
    %182 = arith.mulf %17, %153 : vector<8x64xf32>
    %183 = arith.addf %181, %182 : vector<8x64xf32>
    %cst_69 = arith.constant 1.800000e+00 : f32
    %184 = vector.broadcast %cst_69 : f32 to vector<8x64xf32>
    %185 = arith.mulf %184, %183 : vector<8x64xf32>
    %cst_70 = arith.constant 3.000000e-01 : f32
    %186 = vector.broadcast %cst_70 : f32 to vector<8x64xf32>
    %187 = arith.addf %186, %185 : vector<8x64xf32>
    %188 = arith.mulf %148, %11 : vector<8x64xf32>
    %cst_71 = arith.constant 1.000000e+00 : f32
    %189 = vector.broadcast %cst_71 : f32 to vector<8x64xf32>
    %190 = arith.mulf %189, %180 : vector<8x64xf32>
    %191 = arith.addf %188, %190 : vector<8x64xf32>
    %192 = arith.mulf %187, %153 : vector<8x64xf32>
    %cst_72 = arith.constant 1.000000e+00 : f32
    %193 = vector.broadcast %cst_72 : f32 to vector<8x64xf32>
    %194 = arith.mulf %192, %193 : vector<8x64xf32>
    %195 = arith.subf %191, %194 : vector<8x64xf32>
    %196 = arith.subf %195, %187 : vector<8x64xf32>
    %cst_73 = arith.constant 0.000000e+00 : f32
    %197 = vector.broadcast %cst_73 : f32 to vector<8x64xf32>
    %198 = arith.cmpf ogt, %196, %197 : vector<8x64xf32>
    %199 = arith.extui %198 : vector<8x64xi1> to vector<8x64xi32>
    %200 = arith.sitofp %199 : vector<8x64xi32> to vector<8x64xf32>
    %201 = arith.truncf %200 : vector<8x64xf32> to vector<8x64xbf16>
    %cst_74 = arith.constant dense<0.000000e+00> : vector<8x64xf32>
    %202 = tpu.matmul %201, %8, %cst_74 {dimension_numbers = #tpu.dot_dimension_numbers<[1], [0], [0], [1], [0, 0, 1, 1], [], []>} : vector<8x64xbf16>, vector<64x64xbf16>, vector<8x64xf32> -> vector<8x64xf32>
    %203 = arith.addf %202, %29 : vector<8x64xf32>
    %204 = arith.mulf %23, %159 : vector<8x64xf32>
    %205 = arith.mulf %26, %176 : vector<8x64xf32>
    %206 = arith.addf %204, %205 : vector<8x64xf32>
    %cst_75 = arith.constant 1.800000e+00 : f32
    %207 = vector.broadcast %cst_75 : f32 to vector<8x64xf32>
    %208 = arith.mulf %207, %206 : vector<8x64xf32>
    %cst_76 = arith.constant 3.000000e-01 : f32
    %209 = vector.broadcast %cst_76 : f32 to vector<8x64xf32>
    %210 = arith.addf %209, %208 : vector<8x64xf32>
    %211 = arith.mulf %171, %20 : vector<8x64xf32>
    %cst_77 = arith.constant 1.000000e+00 : f32
    %212 = vector.broadcast %cst_77 : f32 to vector<8x64xf32>
    %213 = arith.mulf %212, %203 : vector<8x64xf32>
    %214 = arith.addf %211, %213 : vector<8x64xf32>
    %215 = arith.mulf %210, %176 : vector<8x64xf32>
    %cst_78 = arith.constant 1.000000e+00 : f32
    %216 = vector.broadcast %cst_78 : f32 to vector<8x64xf32>
    %217 = arith.mulf %215, %216 : vector<8x64xf32>
    %218 = arith.subf %214, %217 : vector<8x64xf32>
    %219 = arith.subf %218, %210 : vector<8x64xf32>
    %cst_79 = arith.constant 0.000000e+00 : f32
    %220 = vector.broadcast %cst_79 : f32 to vector<8x64xf32>
    %221 = arith.cmpf ogt, %219, %220 : vector<8x64xf32>
    %222 = arith.extui %221 : vector<8x64xi1> to vector<8x64xi32>
    %223 = arith.sitofp %222 : vector<8x64xi32> to vector<8x64xf32>
    %224 = vector.extract_strided_slice %6 {offsets = [32, 0], sizes = [8, 64], strides = [1, 1]} : vector<64x64xf32> to vector<8x64xf32>
    %225 = arith.truncf %200 : vector<8x64xf32> to vector<8x64xbf16>
    %cst_80 = arith.constant dense<0.000000e+00> : vector<8x64xf32>
    %226 = tpu.matmul %225, %7, %cst_80 {dimension_numbers = #tpu.dot_dimension_numbers<[1], [0], [0], [1], [0, 0, 1, 1], [], []>} : vector<8x64xbf16>, vector<64x64xbf16>, vector<8x64xf32> -> vector<8x64xf32>
    %227 = arith.addf %224, %226 : vector<8x64xf32>
    %228 = arith.mulf %14, %183 : vector<8x64xf32>
    %229 = arith.mulf %17, %200 : vector<8x64xf32>
    %230 = arith.addf %228, %229 : vector<8x64xf32>
    %cst_81 = arith.constant 1.800000e+00 : f32
    %231 = vector.broadcast %cst_81 : f32 to vector<8x64xf32>
    %232 = arith.mulf %231, %230 : vector<8x64xf32>
    %cst_82 = arith.constant 3.000000e-01 : f32
    %233 = vector.broadcast %cst_82 : f32 to vector<8x64xf32>
    %234 = arith.addf %233, %232 : vector<8x64xf32>
    %235 = arith.mulf %195, %11 : vector<8x64xf32>
    %cst_83 = arith.constant 1.000000e+00 : f32
    %236 = vector.broadcast %cst_83 : f32 to vector<8x64xf32>
    %237 = arith.mulf %236, %227 : vector<8x64xf32>
    %238 = arith.addf %235, %237 : vector<8x64xf32>
    %239 = arith.mulf %234, %200 : vector<8x64xf32>
    %cst_84 = arith.constant 1.000000e+00 : f32
    %240 = vector.broadcast %cst_84 : f32 to vector<8x64xf32>
    %241 = arith.mulf %239, %240 : vector<8x64xf32>
    %242 = arith.subf %238, %241 : vector<8x64xf32>
    %243 = arith.subf %242, %234 : vector<8x64xf32>
    %cst_85 = arith.constant 0.000000e+00 : f32
    %244 = vector.broadcast %cst_85 : f32 to vector<8x64xf32>
    %245 = arith.cmpf ogt, %243, %244 : vector<8x64xf32>
    %246 = arith.extui %245 : vector<8x64xi1> to vector<8x64xi32>
    %247 = arith.sitofp %246 : vector<8x64xi32> to vector<8x64xf32>
    %248 = arith.truncf %247 : vector<8x64xf32> to vector<8x64xbf16>
    %cst_86 = arith.constant dense<0.000000e+00> : vector<8x64xf32>
    %249 = tpu.matmul %248, %8, %cst_86 {dimension_numbers = #tpu.dot_dimension_numbers<[1], [0], [0], [1], [0, 0, 1, 1], [], []>} : vector<8x64xbf16>, vector<64x64xbf16>, vector<8x64xf32> -> vector<8x64xf32>
    %250 = arith.addf %249, %29 : vector<8x64xf32>
    %251 = arith.mulf %23, %206 : vector<8x64xf32>
    %252 = arith.mulf %26, %223 : vector<8x64xf32>
    %253 = arith.addf %251, %252 : vector<8x64xf32>
    %cst_87 = arith.constant 1.800000e+00 : f32
    %254 = vector.broadcast %cst_87 : f32 to vector<8x64xf32>
    %255 = arith.mulf %254, %253 : vector<8x64xf32>
    %cst_88 = arith.constant 3.000000e-01 : f32
    %256 = vector.broadcast %cst_88 : f32 to vector<8x64xf32>
    %257 = arith.addf %256, %255 : vector<8x64xf32>
    %258 = arith.mulf %218, %20 : vector<8x64xf32>
    %cst_89 = arith.constant 1.000000e+00 : f32
    %259 = vector.broadcast %cst_89 : f32 to vector<8x64xf32>
    %260 = arith.mulf %259, %250 : vector<8x64xf32>
    %261 = arith.addf %258, %260 : vector<8x64xf32>
    %262 = arith.mulf %257, %223 : vector<8x64xf32>
    %cst_90 = arith.constant 1.000000e+00 : f32
    %263 = vector.broadcast %cst_90 : f32 to vector<8x64xf32>
    %264 = arith.mulf %262, %263 : vector<8x64xf32>
    %265 = arith.subf %261, %264 : vector<8x64xf32>
    %266 = arith.subf %265, %257 : vector<8x64xf32>
    %cst_91 = arith.constant 0.000000e+00 : f32
    %267 = vector.broadcast %cst_91 : f32 to vector<8x64xf32>
    %268 = arith.cmpf ogt, %266, %267 : vector<8x64xf32>
    %269 = arith.extui %268 : vector<8x64xi1> to vector<8x64xi32>
    %270 = arith.sitofp %269 : vector<8x64xi32> to vector<8x64xf32>
    %271 = vector.extract_strided_slice %6 {offsets = [40, 0], sizes = [8, 64], strides = [1, 1]} : vector<64x64xf32> to vector<8x64xf32>
    %272 = arith.truncf %247 : vector<8x64xf32> to vector<8x64xbf16>
    %cst_92 = arith.constant dense<0.000000e+00> : vector<8x64xf32>
    %273 = tpu.matmul %272, %7, %cst_92 {dimension_numbers = #tpu.dot_dimension_numbers<[1], [0], [0], [1], [0, 0, 1, 1], [], []>} : vector<8x64xbf16>, vector<64x64xbf16>, vector<8x64xf32> -> vector<8x64xf32>
    %274 = arith.addf %271, %273 : vector<8x64xf32>
    %275 = arith.mulf %14, %230 : vector<8x64xf32>
    %276 = arith.mulf %17, %247 : vector<8x64xf32>
    %277 = arith.addf %275, %276 : vector<8x64xf32>
    %cst_93 = arith.constant 1.800000e+00 : f32
    %278 = vector.broadcast %cst_93 : f32 to vector<8x64xf32>
    %279 = arith.mulf %278, %277 : vector<8x64xf32>
    %cst_94 = arith.constant 3.000000e-01 : f32
    %280 = vector.broadcast %cst_94 : f32 to vector<8x64xf32>
    %281 = arith.addf %280, %279 : vector<8x64xf32>
    %282 = arith.mulf %242, %11 : vector<8x64xf32>
    %cst_95 = arith.constant 1.000000e+00 : f32
    %283 = vector.broadcast %cst_95 : f32 to vector<8x64xf32>
    %284 = arith.mulf %283, %274 : vector<8x64xf32>
    %285 = arith.addf %282, %284 : vector<8x64xf32>
    %286 = arith.mulf %281, %247 : vector<8x64xf32>
    %cst_96 = arith.constant 1.000000e+00 : f32
    %287 = vector.broadcast %cst_96 : f32 to vector<8x64xf32>
    %288 = arith.mulf %286, %287 : vector<8x64xf32>
    %289 = arith.subf %285, %288 : vector<8x64xf32>
    %290 = arith.subf %289, %281 : vector<8x64xf32>
    %cst_97 = arith.constant 0.000000e+00 : f32
    %291 = vector.broadcast %cst_97 : f32 to vector<8x64xf32>
    %292 = arith.cmpf ogt, %290, %291 : vector<8x64xf32>
    %293 = arith.extui %292 : vector<8x64xi1> to vector<8x64xi32>
    %294 = arith.sitofp %293 : vector<8x64xi32> to vector<8x64xf32>
    %295 = arith.truncf %294 : vector<8x64xf32> to vector<8x64xbf16>
    %cst_98 = arith.constant dense<0.000000e+00> : vector<8x64xf32>
    %296 = tpu.matmul %295, %8, %cst_98 {dimension_numbers = #tpu.dot_dimension_numbers<[1], [0], [0], [1], [0, 0, 1, 1], [], []>} : vector<8x64xbf16>, vector<64x64xbf16>, vector<8x64xf32> -> vector<8x64xf32>
    %297 = arith.addf %296, %29 : vector<8x64xf32>
    %298 = arith.mulf %23, %253 : vector<8x64xf32>
    %299 = arith.mulf %26, %270 : vector<8x64xf32>
    %300 = arith.addf %298, %299 : vector<8x64xf32>
    %cst_99 = arith.constant 1.800000e+00 : f32
    %301 = vector.broadcast %cst_99 : f32 to vector<8x64xf32>
    %302 = arith.mulf %301, %300 : vector<8x64xf32>
    %cst_100 = arith.constant 3.000000e-01 : f32
    %303 = vector.broadcast %cst_100 : f32 to vector<8x64xf32>
    %304 = arith.addf %303, %302 : vector<8x64xf32>
    %305 = arith.mulf %265, %20 : vector<8x64xf32>
    %cst_101 = arith.constant 1.000000e+00 : f32
    %306 = vector.broadcast %cst_101 : f32 to vector<8x64xf32>
    %307 = arith.mulf %306, %297 : vector<8x64xf32>
    %308 = arith.addf %305, %307 : vector<8x64xf32>
    %309 = arith.mulf %304, %270 : vector<8x64xf32>
    %cst_102 = arith.constant 1.000000e+00 : f32
    %310 = vector.broadcast %cst_102 : f32 to vector<8x64xf32>
    %311 = arith.mulf %309, %310 : vector<8x64xf32>
    %312 = arith.subf %308, %311 : vector<8x64xf32>
    %313 = arith.subf %312, %304 : vector<8x64xf32>
    %cst_103 = arith.constant 0.000000e+00 : f32
    %314 = vector.broadcast %cst_103 : f32 to vector<8x64xf32>
    %315 = arith.cmpf ogt, %313, %314 : vector<8x64xf32>
    %316 = arith.extui %315 : vector<8x64xi1> to vector<8x64xi32>
    %317 = arith.sitofp %316 : vector<8x64xi32> to vector<8x64xf32>
    %318 = vector.extract_strided_slice %6 {offsets = [48, 0], sizes = [8, 64], strides = [1, 1]} : vector<64x64xf32> to vector<8x64xf32>
    %319 = arith.truncf %294 : vector<8x64xf32> to vector<8x64xbf16>
    %cst_104 = arith.constant dense<0.000000e+00> : vector<8x64xf32>
    %320 = tpu.matmul %319, %7, %cst_104 {dimension_numbers = #tpu.dot_dimension_numbers<[1], [0], [0], [1], [0, 0, 1, 1], [], []>} : vector<8x64xbf16>, vector<64x64xbf16>, vector<8x64xf32> -> vector<8x64xf32>
    %321 = arith.addf %318, %320 : vector<8x64xf32>
    %322 = arith.mulf %14, %277 : vector<8x64xf32>
    %323 = arith.mulf %17, %294 : vector<8x64xf32>
    %324 = arith.addf %322, %323 : vector<8x64xf32>
    %cst_105 = arith.constant 1.800000e+00 : f32
    %325 = vector.broadcast %cst_105 : f32 to vector<8x64xf32>
    %326 = arith.mulf %325, %324 : vector<8x64xf32>
    %cst_106 = arith.constant 3.000000e-01 : f32
    %327 = vector.broadcast %cst_106 : f32 to vector<8x64xf32>
    %328 = arith.addf %327, %326 : vector<8x64xf32>
    %329 = arith.mulf %289, %11 : vector<8x64xf32>
    %cst_107 = arith.constant 1.000000e+00 : f32
    %330 = vector.broadcast %cst_107 : f32 to vector<8x64xf32>
    %331 = arith.mulf %330, %321 : vector<8x64xf32>
    %332 = arith.addf %329, %331 : vector<8x64xf32>
    %333 = arith.mulf %328, %294 : vector<8x64xf32>
    %cst_108 = arith.constant 1.000000e+00 : f32
    %334 = vector.broadcast %cst_108 : f32 to vector<8x64xf32>
    %335 = arith.mulf %333, %334 : vector<8x64xf32>
    %336 = arith.subf %332, %335 : vector<8x64xf32>
    %337 = arith.subf %336, %328 : vector<8x64xf32>
    %cst_109 = arith.constant 0.000000e+00 : f32
    %338 = vector.broadcast %cst_109 : f32 to vector<8x64xf32>
    %339 = arith.cmpf ogt, %337, %338 : vector<8x64xf32>
    %340 = arith.extui %339 : vector<8x64xi1> to vector<8x64xi32>
    %341 = arith.sitofp %340 : vector<8x64xi32> to vector<8x64xf32>
    %342 = arith.truncf %341 : vector<8x64xf32> to vector<8x64xbf16>
    %cst_110 = arith.constant dense<0.000000e+00> : vector<8x64xf32>
    %343 = tpu.matmul %342, %8, %cst_110 {dimension_numbers = #tpu.dot_dimension_numbers<[1], [0], [0], [1], [0, 0, 1, 1], [], []>} : vector<8x64xbf16>, vector<64x64xbf16>, vector<8x64xf32> -> vector<8x64xf32>
    %344 = arith.addf %343, %29 : vector<8x64xf32>
    %345 = arith.mulf %23, %300 : vector<8x64xf32>
    %346 = arith.mulf %26, %317 : vector<8x64xf32>
    %347 = arith.addf %345, %346 : vector<8x64xf32>
    %cst_111 = arith.constant 1.800000e+00 : f32
    %348 = vector.broadcast %cst_111 : f32 to vector<8x64xf32>
    %349 = arith.mulf %348, %347 : vector<8x64xf32>
    %cst_112 = arith.constant 3.000000e-01 : f32
    %350 = vector.broadcast %cst_112 : f32 to vector<8x64xf32>
    %351 = arith.addf %350, %349 : vector<8x64xf32>
    %352 = arith.mulf %312, %20 : vector<8x64xf32>
    %cst_113 = arith.constant 1.000000e+00 : f32
    %353 = vector.broadcast %cst_113 : f32 to vector<8x64xf32>
    %354 = arith.mulf %353, %344 : vector<8x64xf32>
    %355 = arith.addf %352, %354 : vector<8x64xf32>
    %356 = arith.mulf %351, %317 : vector<8x64xf32>
    %cst_114 = arith.constant 1.000000e+00 : f32
    %357 = vector.broadcast %cst_114 : f32 to vector<8x64xf32>
    %358 = arith.mulf %356, %357 : vector<8x64xf32>
    %359 = arith.subf %355, %358 : vector<8x64xf32>
    %360 = arith.subf %359, %351 : vector<8x64xf32>
    %cst_115 = arith.constant 0.000000e+00 : f32
    %361 = vector.broadcast %cst_115 : f32 to vector<8x64xf32>
    %362 = arith.cmpf ogt, %360, %361 : vector<8x64xf32>
    %363 = arith.extui %362 : vector<8x64xi1> to vector<8x64xi32>
    %364 = arith.sitofp %363 : vector<8x64xi32> to vector<8x64xf32>
    %365 = vector.extract_strided_slice %6 {offsets = [56, 0], sizes = [8, 64], strides = [1, 1]} : vector<64x64xf32> to vector<8x64xf32>
    %366 = arith.truncf %341 : vector<8x64xf32> to vector<8x64xbf16>
    %cst_116 = arith.constant dense<0.000000e+00> : vector<8x64xf32>
    %367 = tpu.matmul %366, %7, %cst_116 {dimension_numbers = #tpu.dot_dimension_numbers<[1], [0], [0], [1], [0, 0, 1, 1], [], []>} : vector<8x64xbf16>, vector<64x64xbf16>, vector<8x64xf32> -> vector<8x64xf32>
    %368 = arith.addf %365, %367 : vector<8x64xf32>
    %369 = arith.mulf %14, %324 : vector<8x64xf32>
    %370 = arith.mulf %17, %341 : vector<8x64xf32>
    %371 = arith.addf %369, %370 : vector<8x64xf32>
    %cst_117 = arith.constant 1.800000e+00 : f32
    %372 = vector.broadcast %cst_117 : f32 to vector<8x64xf32>
    %373 = arith.mulf %372, %371 : vector<8x64xf32>
    %cst_118 = arith.constant 3.000000e-01 : f32
    %374 = vector.broadcast %cst_118 : f32 to vector<8x64xf32>
    %375 = arith.addf %374, %373 : vector<8x64xf32>
    %376 = arith.mulf %336, %11 : vector<8x64xf32>
    %cst_119 = arith.constant 1.000000e+00 : f32
    %377 = vector.broadcast %cst_119 : f32 to vector<8x64xf32>
    %378 = arith.mulf %377, %368 : vector<8x64xf32>
    %379 = arith.addf %376, %378 : vector<8x64xf32>
    %380 = arith.mulf %375, %341 : vector<8x64xf32>
    %cst_120 = arith.constant 1.000000e+00 : f32
    %381 = vector.broadcast %cst_120 : f32 to vector<8x64xf32>
    %382 = arith.mulf %380, %381 : vector<8x64xf32>
    %383 = arith.subf %379, %382 : vector<8x64xf32>
    %384 = arith.subf %383, %375 : vector<8x64xf32>
    %cst_121 = arith.constant 0.000000e+00 : f32
    %385 = vector.broadcast %cst_121 : f32 to vector<8x64xf32>
    %386 = arith.cmpf ogt, %384, %385 : vector<8x64xf32>
    %387 = arith.extui %386 : vector<8x64xi1> to vector<8x64xi32>
    %388 = arith.sitofp %387 : vector<8x64xi32> to vector<8x64xf32>
    %389 = arith.truncf %388 : vector<8x64xf32> to vector<8x64xbf16>
    %cst_122 = arith.constant dense<0.000000e+00> : vector<8x64xf32>
    %390 = tpu.matmul %389, %8, %cst_122 {dimension_numbers = #tpu.dot_dimension_numbers<[1], [0], [0], [1], [0, 0, 1, 1], [], []>} : vector<8x64xbf16>, vector<64x64xbf16>, vector<8x64xf32> -> vector<8x64xf32>
    %391 = arith.addf %390, %29 : vector<8x64xf32>
    %392 = arith.mulf %23, %347 : vector<8x64xf32>
    %393 = arith.mulf %26, %364 : vector<8x64xf32>
    %394 = arith.addf %392, %393 : vector<8x64xf32>
    %cst_123 = arith.constant 1.800000e+00 : f32
    %395 = vector.broadcast %cst_123 : f32 to vector<8x64xf32>
    %396 = arith.mulf %395, %394 : vector<8x64xf32>
    %cst_124 = arith.constant 3.000000e-01 : f32
    %397 = vector.broadcast %cst_124 : f32 to vector<8x64xf32>
    %398 = arith.addf %397, %396 : vector<8x64xf32>
    %399 = arith.mulf %359, %20 : vector<8x64xf32>
    %cst_125 = arith.constant 1.000000e+00 : f32
    %400 = vector.broadcast %cst_125 : f32 to vector<8x64xf32>
    %401 = arith.mulf %400, %391 : vector<8x64xf32>
    %402 = arith.addf %399, %401 : vector<8x64xf32>
    %403 = arith.mulf %398, %364 : vector<8x64xf32>
    %cst_126 = arith.constant 1.000000e+00 : f32
    %404 = vector.broadcast %cst_126 : f32 to vector<8x64xf32>
    %405 = arith.mulf %403, %404 : vector<8x64xf32>
    %406 = arith.subf %402, %405 : vector<8x64xf32>
    %407 = arith.subf %406, %398 : vector<8x64xf32>
    %cst_127 = arith.constant 0.000000e+00 : f32
    %408 = vector.broadcast %cst_127 : f32 to vector<8x64xf32>
    %409 = arith.cmpf ogt, %407, %408 : vector<8x64xf32>
    %410 = arith.extui %409 : vector<8x64xi1> to vector<8x64xi32>
    %411 = arith.sitofp %410 : vector<8x64xi32> to vector<8x64xf32>
    %c0_128 = arith.constant 0 : index
    %c0_129 = arith.constant 0 : index
    %412 = vector.load %arg7[%c0_128, %c0_129] : memref<64x128xbf16, #tpu.memory_space<vmem>>, vector<64x128xbf16>
    %c0_130 = arith.constant 0 : index
    %c0_131 = arith.constant 0 : index
    %413 = vector.load %arg8[%c0_130, %c0_131] : memref<1x128xf32, #tpu.memory_space<vmem>>, vector<1x128xf32>
    %414 = arith.truncf %411 : vector<8x64xf32> to vector<8x64xbf16>
    %cst_132 = arith.constant dense<0.000000e+00> : vector<8x128xf32>
    %415 = tpu.matmul %414, %412, %cst_132 {dimension_numbers = #tpu.dot_dimension_numbers<[1], [0], [0], [1], [0, 0, 1, 1], [], []>} : vector<8x64xbf16>, vector<64x128xbf16>, vector<8x128xf32> -> vector<8x128xf32>
    %416 = vector.broadcast %413 : vector<1x128xf32> to vector<8x128xf32>
    %417 = arith.addf %415, %416 : vector<8x128xf32>
    %c0_133 = arith.constant 0 : index
    %c0_134 = arith.constant 0 : index
    %c0_135 = arith.constant 0 : index
    %418 = vector.load %arg17[%c0_133, %c0_134, %c0_135] : memref<1x8x128xf32, #tpu.memory_space<vmem>>, vector<1x8x128xf32>
    %419 = vector.shape_cast %418 : vector<1x8x128xf32> to vector<8x128xf32>
    %420 = vector.shape_cast %417 : vector<8x128xf32> to vector<1x8x128xf32>
    tpu.vector_store %arg17[%c0_133, %c0_134, %c0_135], %420 {strides = array<i32>} : memref<1x8x128xf32, #tpu.memory_space<vmem>>, vector<1x8x128xf32>,
    return
  }
  func.func @transform_0(%arg0: i32) -> (i32, i32, i32) {
    %c0_i32 = arith.constant 0 : i32
    %c0_i32_0 = arith.constant 0 : i32
    %c0_i32_1 = arith.constant 0 : i32
    return %arg0, %c0_i32, %c0_i32_0 : i32, i32, i32
  }
  func.func @transform_1(%arg0: i32) -> (i32, i32) {
    %c0_i32 = arith.constant 0 : i32
    %c0_i32_0 = arith.constant 0 : i32
    %c0_i32_1 = arith.constant 0 : i32
    return %c0_i32, %c0_i32_0 : i32, i32
  }
  func.func @transform_2(%arg0: i32) -> (i32, i32) {
    %c0_i32 = arith.constant 0 : i32
    %c0_i32_0 = arith.constant 0 : i32
    %c0_i32_1 = arith.constant 0 : i32
    return %c0_i32, %c0_i32_0 : i32, i32
  }
  func.func @transform_3(%arg0: i32) -> (i32, i32) {
    %c0_i32 = arith.constant 0 : i32
    %c0_i32_0 = arith.constant 0 : i32
    %c0_i32_1 = arith.constant 0 : i32
    return %c0_i32, %c0_i32_0 : i32, i32
  }
  func.func @transform_4(%arg0: i32) -> (i32, i32) {
    %c0_i32 = arith.constant 0 : i32
    %c0_i32_0 = arith.constant 0 : i32
    %c0_i32_1 = arith.constant 0 : i32
    return %c0_i32, %c0_i32_0 : i32, i32
  }
  func.func @transform_5(%arg0: i32) -> (i32, i32) {
    %c0_i32 = arith.constant 0 : i32
    %c0_i32_0 = arith.constant 0 : i32
    %c0_i32_1 = arith.constant 0 : i32
    return %c0_i32, %c0_i32_0 : i32, i32
  }
  func.func @transform_6(%arg0: i32) -> (i32, i32) {
    %c0_i32 = arith.constant 0 : i32
    %c0_i32_0 = arith.constant 0 : i32
    %c0_i32_1 = arith.constant 0 : i32
    return %c0_i32, %c0_i32_0 : i32, i32
  }
  func.func @transform_7(%arg0: i32) -> (i32, i32) {
    %c0_i32 = arith.constant 0 : i32
    %c0_i32_0 = arith.constant 0 : i32
    %c0_i32_1 = arith.constant 0 : i32
    return %c0_i32, %c0_i32_0 : i32, i32
  }
  func.func @transform_8(%arg0: i32) -> (i32, i32) {
    %c0_i32 = arith.constant 0 : i32
    %c0_i32_0 = arith.constant 0 : i32
    %c0_i32_1 = arith.constant 0 : i32
    return %c0_i32, %c0_i32_0 : i32, i32
  }
  func.func @transform_9(%arg0: i32) -> (i32, i32) {
    %c0_i32 = arith.constant 0 : i32
    %c0_i32_0 = arith.constant 0 : i32
    %c0_i32_1 = arith.constant 0 : i32
    return %c0_i32, %c0_i32_0 : i32, i32
  }
  func.func @transform_10(%arg0: i32) -> (i32, i32) {
    %c0_i32 = arith.constant 0 : i32
    %c0_i32_0 = arith.constant 0 : i32
    %c0_i32_1 = arith.constant 0 : i32
    return %c0_i32, %c0_i32_0 : i32, i32
  }
  func.func @transform_11(%arg0: i32) -> (i32, i32) {
    %c0_i32 = arith.constant 0 : i32
    %c0_i32_0 = arith.constant 0 : i32
    %c0_i32_1 = arith.constant 0 : i32
    return %c0_i32, %c0_i32_0 : i32, i32
  }
  func.func @transform_12(%arg0: i32) -> (i32, i32) {
    %c0_i32 = arith.constant 0 : i32
    %c0_i32_0 = arith.constant 0 : i32
    %c0_i32_1 = arith.constant 0 : i32
    return %c0_i32, %c0_i32_0 : i32, i32
  }
  func.func @transform_13(%arg0: i32) -> (i32, i32) {
    %c0_i32 = arith.constant 0 : i32
    %c0_i32_0 = arith.constant 0 : i32
    %c0_i32_1 = arith.constant 0 : i32
    return %c0_i32, %c0_i32_0 : i32, i32
  }
  func.func @transform_14(%arg0: i32) -> (i32, i32, i32) {
    %c0_i32 = arith.constant 0 : i32
    %c0_i32_0 = arith.constant 0 : i32
    %c0_i32_1 = arith.constant 0 : i32
    return %arg0, %c0_i32, %c0_i32_0 : i32, i32, i32
  }
  func.func @transform_15(%arg0: i32) -> (i32, i32, i32) {
    %c0_i32 = arith.constant 0 : i32
    %c0_i32_0 = arith.constant 0 : i32
    %c0_i32_1 = arith.constant 0 : i32
    return %arg0, %c0_i32, %c0_i32_0 : i32, i32, i32
  }
  func.func @transform_16(%arg0: i32) -> (i32, i32, i32) {
    %c0_i32 = arith.constant 0 : i32
    %c0_i32_0 = arith.constant 0 : i32
    %c0_i32_1 = arith.constant 0 : i32
    return %arg0, %c0_i32, %c0_i32_0 : i32, i32, i32
  }
}

</mosaic_0001>

<bundles_post_ra>
// kernel: tpu_custom_call.1
= control target key start
LH: loop header
LB: loop body
LE: loop exit
PB: predicated region body
PF: predicated region fallthrough
CT: control target
= control target key end

     0   :  { %s2284_s0 = inlined_call_operand.vmem [shape: bf16[1,64,16], index: 0, kind: input, shape index: {}]   ;;  %s2285_s1 = inlined_call_operand.vmem [shape: bf16[16,64], index: 1, kind: input, shape index: {}]   ;;  %s2286_s2 = inlined_call_operand.vmem [shape: f32[1,64], index: 2, kind: input, shape index: {}]   ;;  %s2287_s3 = inlined_call_operand.vmem [shape: bf16[64,64], index: 3, kind: input, shape index: {}]   ;;  %s2288_s4 = inlined_call_operand.hbm [shape: bf16[64,64], index: 4, kind: input, shape index: {}]   ;;  %s2289_s5 = inlined_call_operand.vmem [shape: f32[1,64], index: 5, kind: input, shape index: {}]   ;;  %s2290_s6 = inlined_call_operand.hbm [shape: bf16[64,128], index: 6, kind: input, shape index: {}]   ;;  %s2291_s7 = inlined_call_operand.vmem [shape: f32[1,128], index: 7, kind: input, shape index: {}]   ;;  %s2292_s8 = inlined_call_operand.vmem [shape: f32[1,64], index: 8, kind: input, shape index: {}]   ;;  %s2293_s9 = inlined_call_operand.vmem [shape: f32[1,64], index: 9, kind: input, shape index: {}]   ;;  %s2294_s10 = inlined_call_operand.vmem [shape: f32[1,64], index: 10, kind: input, shape index: {}]   ;;  %s2295_s11 = inlined_call_operand.vmem [shape: f32[1,64], index: 11, kind: input, shape index: {}]   ;;  %s2296_s12 = inlined_call_operand.vmem [shape: f32[1,64], index: 12, kind: input, shape index: {}]   ;;  %s2297_s13 = inlined_call_operand.vmem [shape: f32[1,64], index: 13, kind: input, shape index: {}]   ;;  %s2298_s14 = inlined_call_operand.vmem [shape: f32[1,8,64], index: 14, kind: input, shape index: {}]   ;;  %s2299_s15 = inlined_call_operand.vmem [shape: f32[1,8,64], index: 15, kind: input, shape index: {}]   ;;  %s2300_s16 = inlined_call_operand.hbm [shape: f32[1,8,128], index: 16, kind: output, shape index: {}]  }
   0x1   :  { %2302 = sst [smem:[#allocation11_spill]] %s2284_s0 }
   0x2   :  { %21 = vsyncpa [#allocation3], 0 }
   0x3   :  { %22 = vsyncpa [#allocation6], 0 }
   0x4   :  { %23 = vsyncpa [#allocation4], 0  ;;  %s1775_s21 = smov [#allocation2]   ;;  %s1703_s25 = scalar_lea.hbm %s2288_s4, 512 }
   0x5   :  { %s37_s22 = sshll.u32 %s1775_s21, 4  ;;  %p1704_p0 = scmp.ne.s32.totalorder %s2288_s4, %s1703_s25  ;;  %s38_s22 = int_to_ptr.vmem [resolvable:$true] %s37_s22 }
   0x6   :  { %p1707_p1 = scmp.lt.u32.totalorder %s1703_s25, %s2288_s4 }
   0x8   :  { %p1709_p2 = pnand %p1707_p1, %p1704_p0 }
   0xa   :  { %1712 = shalt.err (!%p1709_p2)
}
   0xb   :  { %s1713_s30 = scalar_lea.vmem %s38_s22, 512  ;;  %p1718_p4 = scmp.lt.s32.totalorder %s38_s22, %s38_s22 }
   0xc   :  { %p1714_p3 = scmp.ne.s32.totalorder %s38_s22, %s1713_s30  ;;  %p1719_p5 = scmp.lt.s32.totalorder %s1713_s30, %s1713_s30 }
   0xe   :  { %p1720_p6 = por %p1719_p5, %p1718_p4 }
  0x10   :  { %p1721_p7 = pnand %p1720_p6, %p1714_p3 }
  0x12   :  { %1724 = shalt.err (!%p1721_p7)
}
  0x13   :  { %s1776_s0 = smov 64   ;;  %s1777_s17 = smov 4  }
  0x14   :  { %43 = dma.hbm_to_vmem [thread:$0]  %s2288_s4, 512, %s38_s22, [#allocation3], %s1776_s0, %s1776_s0, %s1777_s17  }
  0x15   :  { %s1778_s20 = smov [#allocation5]   ;;  %s1725_s25 = scalar_lea.hbm %s2290_s6, 512 }
  0x16   :  { %s51_s21 = sshll.u32 %s1778_s20, 4  ;;  %p1726_p8 = scmp.ne.s32.totalorder %s2290_s6, %s1725_s25  ;;  %s52_s21 = int_to_ptr.vmem [resolvable:$true] %s51_s21 }
  0x17   :  { %p1729_p9 = scmp.lt.u32.totalorder %s1725_s25, %s2290_s6 }
  0x19   :  { %p1731_p10 = pnand %p1729_p9, %p1726_p8 }
  0x1b   :  { %1734 = shalt.err (!%p1731_p10)
}
  0x1c   :  { %s1735_s30 = scalar_lea.vmem %s52_s21, 512  ;;  %p1740_p12 = scmp.lt.s32.totalorder %s52_s21, %s52_s21 }
  0x1d   :  { %p1736_p11 = scmp.ne.s32.totalorder %s52_s21, %s1735_s30  ;;  %p1741_p13 = scmp.lt.s32.totalorder %s1735_s30, %s1735_s30 }
  0x1f   :  { %p1742_p0 = por %p1741_p13, %p1740_p12 }
  0x21   :  { %p1743_p1 = pnand %p1742_p0, %p1736_p11 }
  0x23   :  { %1746 = shalt.err (!%p1743_p1)
}
  0x24   :  { %57 = dma.hbm_to_vmem [thread:$0]  %s2290_s6, 512, %s52_s21, [#allocation6], %s1776_s0, %s1776_s0, %s1777_s17  }
  0x25   :  { %1769 = dma.done.wait [#allocation3], 512  }
  0x26   :  { %1770 = vsyncadd [#allocation3], 4294966784 }
  0x27   :  { %1771 = dma.done.wait [#allocation6], 512  }
  0x28   :  { %1772 = vsyncadd [#allocation6], 4294966784  ;;  %v1779_v0 = vmov 0.0   ;;  %vm1780_vm0 = vmmov 0   ;;  %v1897_v1 = vld [vmem:[%s2287_s3] sm:$0xff]   ;;  %v1902_v2 = vld [vmem:[%s2287_s3 + $0x8] sm:$0xff]  }
  0x29   :  { %1475 = vmatprep.subr.bf16.mxu1 %v1779_v0  ;;  %1483 = vmatprep.mubr.msk.bf16.mxu1 %vm1780_vm0, %v1779_v0  ;;  %v1688_v3 = vld [vmem:[%s2285_s1] sm:$0xff]   ;;  %vm126_vm1 = vcmask 130048   ;;  %s2303_s24 = sld [smem:[#allocation11_spill]]  ;;  %v1920_v6 = vld [vmem:[%s2287_s3 + $0x10] sm:$0xff]   ;;  %v1928_v7 = vld [vmem:[%s2287_s3 + $0x18] sm:$0xff]   ;;  %vm296_vm2 = vcmask 523264  }
  0x2a   :  { %1476 = vmatpush3.bf16.msra.mxu1 %v1897_v1  ;;  %1465 = vmatprep.subr.bf16.mxu0 %v1688_v3  ;;  %v269_v8 = vld [vmem:[%s2298_s14] sm:$0xff]  ;;  %v1952_v11 = vld [vmem:[#allocation2 + $0x8] sm:$0xff]   ;;  %v1963_v14 = vld [vmem:[#allocation2 + $0x10] sm:$0xff]  }
  0x2b   :  { %1477 = vmatprep.subr.bf16.mxu1 %v1779_v0  ;;  %1466 = vmatpush3.bf16.msra.mxu0 %v1688_v3  ;;  %v271_v9 = vpack.c.bf16 %v269_v8, %v269_v8  ;;  %v1948_v10 = vld [vmem:[#allocation2] sm:$0xff]   ;;  %v1970_v15 = vld [vmem:[#allocation2 + $0x18] sm:$0xff]  }
  0x2c   :  { %1487 = vmatprep.subr.bf16.mxu0 %v1779_v0  ;;  %v1977_v16 = vld [vmem:[%s2293_s9] ss:$0 sm:$0xff] }
  0x2d   :  { %v1982_v17 = vld [vmem:[%s2294_s10] ss:$0 sm:$0xff]  ;;  %v341_v18 = vmul.f32 0.01, %v1977_v16 }
  0x2e   :  { %1478 = vmatpush3.bf16.msra.mxu1 %v1902_v2  ;;  %v342_v19 = vmul.f32 %v1982_v17, %v269_v8  ;;  %v1993_v25 = vld [vmem:[%s2286_s2] ss:$0 sm:$0xff] }
  0x2f   :  { %v1689_v4 = vld [vmem:[%s2303_s24] sm:$0xff]   ;;  %v1691_v5 = vld [vmem:[%s2303_s24 + $0x8] sm:$0xff]   ;;  %1479 = vmatprep.subr.bf16.mxu1 %v1779_v0  ;;  %v1695_v12 = vld [vmem:[%s2303_s24 + $0x10] sm:$0xff]  }
  0x30   :  { %1467 = vmatprep.mubr.msk.bf16.mxu0 %vm126_vm1, %v1689_v4  ;;  %v1696_v13 = vld [vmem:[%s2303_s24 + $0x18] sm:$0xff]   ;;  %v343_v20 = vadd.f32 %v342_v19, %v341_v18  ;;  %v1998_v27 = vld [vmem:[%s2292_s8] ss:$0 sm:$0xff] }
  0x31   :  { %1468 = vmatmul.mubr.msk.bf16.vlgmr.msra.gmra.mrb[0].mxu0 %vm126_vm1, %v1691_v5  ;;  %v346_v30 = vmul.f32 %v1998_v27, %v269_v8 }
  0x32   :  { %1480 = vmatpush3.bf16.msra.mxu1 %v1920_v6  ;;  %1488 = vmatpush3.bf16.msra.mxu0 %v1948_v10  ;;  %v344_v24 = vmul.f32 1.8, %v343_v20  ;;  %v476_v40 = vmul.f32 %v1977_v16, %v343_v20 }
  0x33   :  { %1481 = vmatprep.subr.bf16.mxu1 %v1779_v0  ;;  %1489 = vmatprep.subr.bf16.mxu0 %v1779_v0 }
  0x34   :  { %1471 = vmatprep.mubr.msk.bf16.mxu0 %vm126_vm1, %v1695_v12  ;;  %v345_v29 = vadd.f32 0.3, %v344_v24  ;;  %v2073_v24 = vld [vmem:[%s2297_s13] ss:$0 sm:$0xff]  ;;  %s1781_s13 = smov [#allocation7]  }
  0x36   :  { %1482 = vmatpush3.bf16.msra.mxu1 %v1928_v7  ;;  %1490 = vmatpush3.bf16.msra.mxu0 %v1952_v11  ;;  %v348_v33 = vmul.f32 %v345_v29, %v269_v8 }
  0x37   :  { %1499 = vmatprep.subr.bf16.mxu1 %v1779_v0  ;;  %1491 = vmatprep.subr.bf16.mxu0 %v1779_v0 }
  0x39   :  { %1484 = vmatmul.mubr.msk.bf16.vlgmr.msra.gmra.mrb[0].mxu1 %vm296_vm2, %v271_v9  ;;  %1472 = vmatmul.mubr.msk.bf16.gmra.mrb[4].mxu0 %vm126_vm1, %v1696_v13 }
  0x3a   :  { %1500 = vmatpush3.bf16.msra.mxu1 %v1897_v1  ;;  %1507 = vmatprep.mubr.msk.bf16.mxu1 %vm1780_vm0, %v1779_v0 }
  0x3b   :  { %1501 = vmatprep.subr.bf16.mxu1 %v1779_v0  ;;  %1492 = vmatpush3.bf16.msra.mxu0 %v1963_v14 }
  0x3c   :  { %1495 = vmatprep.mubr.msk.bf16.mxu0 %vm1780_vm0, %v1779_v0  ;;  %1493 = vmatprep.subr.bf16.mxu0 %v1779_v0 }
  0x3e   :  { %1502 = vmatpush3.bf16.msra.mxu1 %v1902_v2 }
  0x3f   :  { %1503 = vmatprep.subr.bf16.mxu1 %v1779_v0  ;;  %1494 = vmatpush3.bf16.msra.mxu0 %v1970_v15 }
  0x40   :  { %1511 = vmatprep.subr.bf16.mxu0 %v1779_v0 }
  0x42   :  { %1504 = vmatpush3.bf16.msra.mxu1 %v1920_v6 }
  0x43   :  { %1505 = vmatprep.subr.bf16.mxu1 %v1779_v0 }
  0x46   :  { %1506 = vmatpush3.bf16.msra.mxu1 %v1928_v7 }
  0x47   :  { %1523 = vmatprep.subr.bf16.mxu1 %v1779_v0 }
 0x104   :  { %v1986_v21 = vpop.f32.mrb[0].mxu0 }
 0x105   :  { %v173_v22 = vpop.f32.mrb[1].mxu0 }
 0x106   :  { %v1988_v23 = vpop.f32.mrb[2].mxu0  ;;  %v174_v28 = vadd.f32 %v1993_v25, %v173_v22  ;;  %v2068_v22 = vld [vmem:[%s2296_s12] ss:$0 sm:$0xff] }
 0x107   :  { %v176_v26 = vpop.f32.mrb[3].mxu0 }
 0x108   :  { %v177_v52 = vadd.f32 %v1993_v25, %v176_v26  ;;  %v270_v26 = vld [vmem:[%s2299_s15] sm:$0xff]  ;;  %s1302_s15 = sshll.u32 %s1781_s13, 4  ;;  %s1303_s15 = int_to_ptr.vmem [resolvable:$true] %s1302_s15 }
 0x109   :  { %s1747_s29 = scalar_lea.vmem %s1303_s15, 128  ;;  %p1752_p3 = scmp.lt.s32.totalorder %s1303_s15, %s1303_s15 }
 0x10a   :  { %p1748_p2 = scmp.ne.s32.totalorder %s1303_s15, %s1747_s29  ;;  %p1753_p4 = scmp.lt.s32.totalorder %s1747_s29, %s1747_s29 }
 0x10c   :  { %v334_v31 = vpop.f32.mrb[0].mxu1  ;;  %v2027_v48 = vpop.f32.mrb[4].mxu0  ;;  %p1754_p5 = por %p1753_p4, %p1752_p3 }
 0x10d   :  { %v340_v32 = vadd.f32 %v334_v31, %v174_v28  ;;  %v1485_v34 = vpop.f32.mrb[1].mxu1  ;;  %v2029_v49 = vpop.f32.mrb[5].mxu0  ;;  %v422_v28 = vmul.f32 0.01, %v2068_v22 }
 0x10e   :  { %v337_v35 = vpop.f32.mrb[2].mxu1  ;;  %v2031_v50 = vpop.f32.mrb[6].mxu0  ;;  %p1755_p6 = pnand %p1754_p5, %p1748_p2 }
 0x10f   :  { %v347_v36 = vadd.f32 %v346_v30, %v340_v32  ;;  %v1486_v37 = vpop.f32.mrb[3].mxu1  ;;  %v2033_v51 = vpop.f32.mrb[7].mxu0  ;;  %v2083_v32 = vld [vmem:[%s2295_s11] ss:$0 sm:$0xff] }
 0x111   :  { %v349_v38 = vsub.f32 %v347_v36, %v348_v33  ;;  %v2088_v33 = vld [vmem:[%s2289_s5] ss:$0 sm:$0xff]  ;;  %v427_v36 = vmul.f32 %v2083_v32, %v270_v26 }
 0x113   :  { %v350_v39 = vsub.f32 %v349_v38, %v345_v29  ;;  %v481_v56 = vmul.f32 %v1998_v27, %v349_v38  ;;  %v423_v29 = vmul.f32 %v2073_v24, %v270_v26 }
 0x115   :  { %vm351_vm3 = vcmp.gt.f32.partialorder %v350_v39, 0.0  ;;  %v424_v30 = vadd.f32 %v423_v29, %v422_v28 }
 0x116   :  { %v1334_v41 = vsel %vm351_vm3, 1.0, %v1779_v0 }
 0x117   :  { %v354_v42 = vpack.c.bf16 %v1334_v41, %v1334_v41  ;;  %v477_v43 = vmul.f32 %v1334_v41, %v1982_v17  ;;  %v425_v31 = vmul.f32 1.8, %v424_v30 }
 0x119   :  { %1496 = vmatmul.mubr.msk.bf16.vlgmr.msra.gmra.mrb[8].mxu0 %vm296_vm2, %v354_v42  ;;  %1508 = vmatmul.mubr.msk.bf16.vlgmr.msra.gmra.mrb[4].mxu1 %vm296_vm2, %v354_v42  ;;  %v478_v44 = vadd.f32 %v477_v43, %v476_v40  ;;  %v426_v35 = vadd.f32 0.3, %v425_v31  ;;  %v533_v42 = vmul.f32 %v2068_v22, %v424_v30 }
 0x11a   :  { %1512 = vmatpush3.bf16.msra.mxu0 %v1948_v10  ;;  %1524 = vmatpush3.bf16.msra.mxu1 %v1897_v1 }
 0x11b   :  { %v479_v45 = vmul.f32 1.8, %v478_v44  ;;  %1513 = vmatprep.subr.bf16.mxu0 %v1779_v0  ;;  %1525 = vmatprep.subr.bf16.mxu1 %v1779_v0  ;;  %v587_v12 = vmul.f32 %v1977_v16, %v478_v44  ;;  %v429_v38 = vmul.f32 %v426_v35, %v270_v26 }
 0x11c   :  { %1519 = vmatprep.mubr.msk.bf16.mxu0 %vm1780_vm0, %v1779_v0  ;;  %1531 = vmatprep.mubr.msk.bf16.mxu1 %vm1780_vm0, %v1779_v0 }
 0x11d   :  { %v480_v46 = vadd.f32 0.3, %v479_v45 }
 0x11e   :  { %1514 = vmatpush3.bf16.msra.mxu0 %v1952_v11  ;;  %1526 = vmatpush3.bf16.msra.mxu1 %v1902_v2 }
 0x11f   :  { %v483_v47 = vmul.f32 %v1334_v41, %v480_v46  ;;  %1515 = vmatprep.subr.bf16.mxu0 %v1779_v0  ;;  %1527 = vmatprep.subr.bf16.mxu1 %v1779_v0 }
 0x122   :  { %1516 = vmatpush3.bf16.msra.mxu0 %v1963_v14  ;;  %1528 = vmatpush3.bf16.msra.mxu1 %v1920_v6 }
 0x123   :  { %1517 = vmatprep.subr.bf16.mxu0 %v1779_v0  ;;  %1529 = vmatprep.subr.bf16.mxu1 %v1779_v0 }
 0x126   :  { %1518 = vmatpush3.bf16.msra.mxu0 %v1970_v15  ;;  %1530 = vmatpush3.bf16.msra.mxu1 %v1928_v7 }
 0x127   :  { %1535 = vmatprep.subr.bf16.mxu0 %v1779_v0  ;;  %1547 = vmatprep.subr.bf16.mxu1 %v1779_v0 }
 0x1ec   :  { %v416_v53 = vpop.f32.mrb[8].mxu0  ;;  %v469_v54 = vpop.f32.mrb[4].mxu1 }
 0x1ed   :  { %v475_v55 = vadd.f32 %v469_v54, %v177_v52  ;;  %v1497_v57 = vpop.f32.mrb[9].mxu0  ;;  %v1509_v58 = vpop.f32.mrb[5].mxu1  ;;  %v417_v34 = vadd.f32 %v2088_v33, %v416_v53 }
 0x1ee   :  { %v419_v59 = vpop.f32.mrb[10].mxu0  ;;  %v472_v60 = vpop.f32.mrb[6].mxu1 }
 0x1ef   :  { %v482_v61 = vadd.f32 %v481_v56, %v475_v55  ;;  %v1498_v62 = vpop.f32.mrb[11].mxu0  ;;  %v1510_v63 = vpop.f32.mrb[7].mxu1  ;;  %v428_v37 = vadd.f32 %v427_v36, %v417_v34 }
 0x1f1   :  { %v484_v3 = vsub.f32 %v482_v61, %v483_v47  ;;  %v430_v39 = vsub.f32 %v428_v37, %v429_v38 }
 0x1f3   :  { %v485_v4 = vsub.f32 %v484_v3, %v480_v46  ;;  %v431_v40 = vsub.f32 %v430_v39, %v426_v35  ;;  %v182_v46 = vadd.f32 %v1986_v21, %v1993_v25  ;;  %v538_v55 = vmul.f32 %v2083_v32, %v430_v39 }
 0x1f4   :  { %v592_v57 = vmul.f32 %v1998_v27, %v484_v3 }
 0x1f5   :  { %vm486_vm4 = vcmp.gt.f32.partialorder %v485_v4, 0.0  ;;  %vm432_vm5 = vcmp.gt.f32.partialorder %v431_v40, 0.0  ;;  %v185_v40 = vadd.f32 %v1988_v23, %v1993_v25 }
 0x1f6   :  { %v1342_v5 = vsel %vm486_vm4, 1.0, %v1779_v0  ;;  %v1340_v41 = vsel %vm432_vm5, 1.0, %v1779_v0 }
 0x1f7   :  { %v489_v8 = vpack.c.bf16 %v1342_v5, %v1342_v5  ;;  %v588_v9 = vmul.f32 %v1342_v5, %v1982_v17  ;;  %v534_v43 = vmul.f32 %v1340_v41, %v2073_v24 }
 0x1f9   :  { %1520 = vmatmul.mubr.msk.bf16.vlgmr.msra.gmra.mrb[12].mxu0 %vm296_vm2, %v489_v8  ;;  %1532 = vmatmul.mubr.msk.bf16.vlgmr.msra.gmra.mrb[8].mxu1 %vm296_vm2, %v489_v8  ;;  %v2042_v13 = vadd.f32 %v588_v9, %v587_v12  ;;  %v535_v44 = vadd.f32 %v534_v43, %v533_v42 }
 0x1fa   :  { %1536 = vmatpush3.bf16.msra.mxu0 %v1948_v10  ;;  %1548 = vmatpush3.bf16.msra.mxu1 %v1897_v1 }
 0x1fb   :  { %v590_v18 = vmul.f32 1.8, %v2042_v13  ;;  %1537 = vmatprep.subr.bf16.mxu0 %v1779_v0  ;;  %1549 = vmatprep.subr.bf16.mxu1 %v1779_v0  ;;  %v536_v45 = vmul.f32 1.8, %v535_v44  ;;  %v644_v3 = vmul.f32 %v2068_v22, %v535_v44  ;;  %v698_v34 = vmul.f32 %v1977_v16, %v2042_v13 }
 0x1fc   :  { %1543 = vmatprep.mubr.msk.bf16.mxu0 %vm1780_vm0, %v1779_v0  ;;  %1555 = vmatprep.mubr.msk.bf16.mxu1 %vm1780_vm0, %v1779_v0 }
 0x1fd   :  { %v591_v19 = vadd.f32 0.3, %v590_v18  ;;  %v537_v47 = vadd.f32 0.3, %v536_v45 }
 0x1fe   :  { %1538 = vmatpush3.bf16.msra.mxu0 %v1952_v11  ;;  %1550 = vmatpush3.bf16.msra.mxu1 %v1902_v2 }
 0x1ff   :  { %v594_v20 = vmul.f32 %v1342_v5, %v591_v19  ;;  %1539 = vmatprep.subr.bf16.mxu0 %v1779_v0  ;;  %1551 = vmatprep.subr.bf16.mxu1 %v1779_v0  ;;  %v540_v63 = vmul.f32 %v1340_v41, %v537_v47 }
 0x202   :  { %1540 = vmatpush3.bf16.msra.mxu0 %v1963_v14  ;;  %1552 = vmatpush3.bf16.msra.mxu1 %v1920_v6 }
 0x203   :  { %1541 = vmatprep.subr.bf16.mxu0 %v1779_v0  ;;  %1553 = vmatprep.subr.bf16.mxu1 %v1779_v0 }
 0x206   :  { %1542 = vmatpush3.bf16.msra.mxu0 %v1970_v15  ;;  %1554 = vmatpush3.bf16.msra.mxu1 %v1928_v7 }
 0x207   :  { %1559 = vmatprep.subr.bf16.mxu0 %v1779_v0  ;;  %1571 = vmatprep.subr.bf16.mxu1 %v1779_v0 }
 0x2cc   :  { %v527_v52 = vpop.f32.mrb[12].mxu0  ;;  %v580_v53 = vpop.f32.mrb[8].mxu1 }
 0x2cd   :  { %v528_v54 = vadd.f32 %v2088_v33, %v527_v52  ;;  %v586_v56 = vadd.f32 %v580_v53, %v182_v46  ;;  %v1521_v58 = vpop.f32.mrb[13].mxu0  ;;  %v1533_v59 = vpop.f32.mrb[9].mxu1 }
 0x2ce   :  { %v530_v60 = vpop.f32.mrb[14].mxu0  ;;  %v583_v61 = vpop.f32.mrb[10].mxu1 }
 0x2cf   :  { %v539_v62 = vadd.f32 %v538_v55, %v528_v54  ;;  %v593_v4 = vadd.f32 %v592_v57, %v586_v56  ;;  %v1522_v5 = vpop.f32.mrb[15].mxu0  ;;  %v1534_v8 = vpop.f32.mrb[11].mxu1 }
 0x2d1   :  { %v541_v21 = vsub.f32 %v539_v62, %v540_v63  ;;  %v595_v9 = vsub.f32 %v593_v4, %v594_v20 }
 0x2d3   :  { %v542_v12 = vsub.f32 %v541_v21, %v537_v47  ;;  %v596_v18 = vsub.f32 %v595_v9, %v591_v19  ;;  %v649_v44 = vmul.f32 %v2083_v32, %v541_v21  ;;  %v703_v46 = vmul.f32 %v1998_v27, %v595_v9 }
 0x2d5   :  { %vm543_vm6 = vcmp.gt.f32.partialorder %v542_v12, 0.0  ;;  %vm597_vm7 = vcmp.gt.f32.partialorder %v596_v18, 0.0 }
 0x2d6   :  { %v1346_v26 = vsel %vm597_vm7, 1.0, %v1779_v0  ;;  %v1344_v28 = vsel %vm543_vm6, 1.0, %v1779_v0 }
 0x2d7   :  { %v600_v29 = vpack.c.bf16 %v1346_v26, %v1346_v26  ;;  %v699_v30 = vmul.f32 %v1346_v26, %v1982_v17  ;;  %v645_v31 = vmul.f32 %v1344_v28, %v2073_v24 }
 0x2d9   :  { %1544 = vmatmul.mubr.msk.bf16.vlgmr.msra.gmra.mrb[16].mxu0 %vm296_vm2, %v600_v29  ;;  %1556 = vmatmul.mubr.msk.bf16.vlgmr.msra.gmra.mrb[12].mxu1 %vm296_vm2, %v600_v29  ;;  %v646_v19 = vadd.f32 %v645_v31, %v644_v3  ;;  %v700_v20 = vadd.f32 %v699_v30, %v698_v34  ;;  %v190_v34 = vadd.f32 %v1993_v25, %v2029_v49 }
 0x2da   :  { %1560 = vmatpush3.bf16.msra.mxu0 %v1948_v10  ;;  %1572 = vmatpush3.bf16.msra.mxu1 %v1897_v1 }
 0x2db   :  { %v647_v35 = vmul.f32 1.8, %v646_v19  ;;  %v701_v36 = vmul.f32 1.8, %v700_v20  ;;  %1561 = vmatprep.subr.bf16.mxu0 %v1779_v0  ;;  %1573 = vmatprep.subr.bf16.mxu1 %v1779_v0  ;;  %v755_v4 = vmul.f32 %v2068_v22, %v646_v19  ;;  %v809_v9 = vmul.f32 %v1977_v16, %v700_v20 }
 0x2dc   :  { %1567 = vmatprep.mubr.msk.bf16.mxu0 %vm1780_vm0, %v1779_v0  ;;  %1579 = vmatprep.mubr.msk.bf16.mxu1 %vm1780_vm0, %v1779_v0 }
 0x2dd   :  { %v648_v13 = vadd.f32 0.3, %v647_v35  ;;  %v702_v37 = vadd.f32 0.3, %v701_v36 }
 0x2de   :  { %1562 = vmatpush3.bf16.msra.mxu0 %v1952_v11  ;;  %1574 = vmatpush3.bf16.msra.mxu1 %v1902_v2 }
 0x2df   :  { %v651_v38 = vmul.f32 %v1344_v28, %v648_v13  ;;  %v705_v39 = vmul.f32 %v1346_v26, %v702_v37  ;;  %1563 = vmatprep.subr.bf16.mxu0 %v1779_v0  ;;  %1575 = vmatprep.subr.bf16.mxu1 %v1779_v0 }
 0x2e2   :  { %1564 = vmatpush3.bf16.msra.mxu0 %v1963_v14  ;;  %1576 = vmatpush3.bf16.msra.mxu1 %v1920_v6 }
 0x2e3   :  { %1565 = vmatprep.subr.bf16.mxu0 %v1779_v0  ;;  %1577 = vmatprep.subr.bf16.mxu1 %v1779_v0 }
 0x2e6   :  { %1566 = vmatpush3.bf16.msra.mxu0 %v1970_v15  ;;  %1578 = vmatpush3.bf16.msra.mxu1 %v1928_v7 }
 0x2e7   :  { %1583 = vmatprep.subr.bf16.mxu0 %v1779_v0  ;;  %1595 = vmatprep.subr.bf16.mxu1 %v1779_v0 }
 0x3ac   :  { %v638_v41 = vpop.f32.mrb[16].mxu0  ;;  %v691_v42 = vpop.f32.mrb[12].mxu1 }
 0x3ad   :  { %v639_v43 = vadd.f32 %v2088_v33, %v638_v41  ;;  %v697_v45 = vadd.f32 %v691_v42, %v185_v40  ;;  %v1545_v47 = vpop.f32.mrb[17].mxu0  ;;  %v1557_v52 = vpop.f32.mrb[13].mxu1 }
 0x3ae   :  { %v641_v53 = vpop.f32.mrb[18].mxu0  ;;  %v694_v54 = vpop.f32.mrb[14].mxu1 }
 0x3af   :  { %v650_v55 = vadd.f32 %v649_v44, %v639_v43  ;;  %v704_v56 = vadd.f32 %v703_v46, %v697_v45  ;;  %v1546_v57 = vpop.f32.mrb[19].mxu0  ;;  %v1558_v58 = vpop.f32.mrb[15].mxu1 }
 0x3b1   :  { %v652_v59 = vsub.f32 %v650_v55, %v651_v38  ;;  %v706_v60 = vsub.f32 %v704_v56, %v705_v39 }
 0x3b3   :  { %v653_v23 = vsub.f32 %v652_v59, %v648_v13  ;;  %v707_v61 = vsub.f32 %v706_v60, %v702_v37  ;;  %v760_v36 = vmul.f32 %v2083_v32, %v652_v59  ;;  %v814_v37 = vmul.f32 %v1998_v27, %v706_v60 }
 0x3b5   :  { %vm654_vm8 = vcmp.gt.f32.partialorder %v653_v23, 0.0  ;;  %vm708_vm9 = vcmp.gt.f32.partialorder %v707_v61, 0.0 }
 0x3b6   :  { %v1350_v62 = vsel %vm708_vm9, 1.0, %v1779_v0  ;;  %v1348_v63 = vsel %vm654_vm8, 1.0, %v1779_v0 }
 0x3b7   :  { %v711_v5 = vpack.c.bf16 %v1350_v62, %v1350_v62  ;;  %v810_v8 = vmul.f32 %v1350_v62, %v1982_v17  ;;  %v756_v21 = vmul.f32 %v1348_v63, %v2073_v24 }
 0x3b9   :  { %1568 = vmatmul.mubr.msk.bf16.vlgmr.msra.gmra.mrb[20].mxu0 %vm296_vm2, %v711_v5  ;;  %1580 = vmatmul.mubr.msk.bf16.vlgmr.msra.gmra.mrb[16].mxu1 %vm296_vm2, %v711_v5  ;;  %v757_v12 = vadd.f32 %v756_v21, %v755_v4  ;;  %v811_v18 = vadd.f32 %v810_v8, %v809_v9  ;;  %v193_v21 = vadd.f32 %v1993_v25, %v2033_v51 }
 0x3ba   :  { %1584 = vmatpush3.bf16.msra.mxu0 %v1948_v10  ;;  %1596 = vmatpush3.bf16.msra.mxu1 %v1897_v1 }
 0x3bb   :  { %v758_v26 = vmul.f32 1.8, %v757_v12  ;;  %v812_v28 = vmul.f32 1.8, %v811_v18  ;;  %1585 = vmatprep.subr.bf16.mxu0 %v1779_v0  ;;  %1597 = vmatprep.subr.bf16.mxu1 %v1779_v0  ;;  %v866_v55 = vmul.f32 %v2068_v22, %v757_v12  ;;  %v920_v59 = vmul.f32 %v1977_v16, %v811_v18 }
 0x3bc   :  { %1591 = vmatprep.mubr.msk.bf16.mxu0 %vm1780_vm0, %v1779_v0  ;;  %1603 = vmatprep.mubr.msk.bf16.mxu1 %vm1780_vm0, %v1779_v0 }
 0x3bd   :  { %v759_v3 = vadd.f32 0.3, %v758_v26  ;;  %v813_v29 = vadd.f32 0.3, %v812_v28 }
 0x3be   :  { %1586 = vmatpush3.bf16.msra.mxu0 %v1952_v11  ;;  %1598 = vmatpush3.bf16.msra.mxu1 %v1902_v2 }
 0x3bf   :  { %v762_v30 = vmul.f32 %v1348_v63, %v759_v3  ;;  %v816_v31 = vmul.f32 %v1350_v62, %v813_v29  ;;  %1587 = vmatprep.subr.bf16.mxu0 %v1779_v0  ;;  %1599 = vmatprep.subr.bf16.mxu1 %v1779_v0 }
 0x3c2   :  { %1588 = vmatpush3.bf16.msra.mxu0 %v1963_v14  ;;  %1600 = vmatpush3.bf16.msra.mxu1 %v1920_v6 }
 0x3c3   :  { %1589 = vmatprep.subr.bf16.mxu0 %v1779_v0  ;;  %1601 = vmatprep.subr.bf16.mxu1 %v1779_v0 }
 0x3c6   :  { %1590 = vmatpush3.bf16.msra.mxu0 %v1970_v15  ;;  %1602 = vmatpush3.bf16.msra.mxu1 %v1928_v7 }
 0x3c7   :  { %1607 = vmatprep.subr.bf16.mxu0 %v1779_v0  ;;  %1619 = vmatprep.subr.bf16.mxu1 %v1779_v0 }
 0x48c   :  { %v749_v19 = vpop.f32.mrb[20].mxu0  ;;  %v802_v20 = vpop.f32.mrb[16].mxu1 }
 0x48d   :  { %v750_v35 = vadd.f32 %v2088_v33, %v749_v19  ;;  %v808_v13 = vadd.f32 %v802_v20, %v190_v34  ;;  %v1569_v38 = vpop.f32.mrb[21].mxu0  ;;  %v1581_v39 = vpop.f32.mrb[17].mxu1 }
 0x48e   :  { %v752_v40 = vpop.f32.mrb[22].mxu0  ;;  %v805_v41 = vpop.f32.mrb[18].mxu1 }
 0x48f   :  { %v761_v42 = vadd.f32 %v760_v36, %v750_v35  ;;  %v815_v43 = vadd.f32 %v814_v37, %v808_v13  ;;  %v1570_v44 = vpop.f32.mrb[23].mxu0  ;;  %v1582_v45 = vpop.f32.mrb[19].mxu1 }
 0x491   :  { %v763_v46 = vsub.f32 %v761_v42, %v762_v30  ;;  %v817_v47 = vsub.f32 %v815_v43, %v816_v31 }
 0x493   :  { %v764_v49 = vsub.f32 %v763_v46, %v759_v3  ;;  %v818_v52 = vsub.f32 %v817_v47, %v813_v29  ;;  %v871_v26 = vmul.f32 %v2083_v32, %v763_v46  ;;  %v925_v3 = vmul.f32 %v1998_v27, %v817_v47 }
 0x495   :  { %vm765_vm10 = vcmp.gt.f32.partialorder %v764_v49, 0.0  ;;  %vm819_vm11 = vcmp.gt.f32.partialorder %v818_v52, 0.0 }
 0x496   :  { %v1354_v53 = vsel %vm819_vm11, 1.0, %v1779_v0  ;;  %v1352_v54 = vsel %vm765_vm10, 1.0, %v1779_v0 }
 0x497   :  { %v822_v56 = vpack.c.bf16 %v1354_v53, %v1354_v53  ;;  %v921_v57 = vmul.f32 %v1354_v53, %v1982_v17  ;;  %v867_v58 = vmul.f32 %v1352_v54, %v2073_v24 }
 0x499   :  { %1592 = vmatmul.mubr.msk.bf16.vlgmr.msra.gmra.mrb[24].mxu0 %vm296_vm2, %v822_v56  ;;  %1604 = vmatmul.mubr.msk.bf16.vlgmr.msra.gmra.mrb[20].mxu1 %vm296_vm2, %v822_v56  ;;  %v868_v60 = vadd.f32 %v867_v58, %v866_v55  ;;  %v922_v23 = vadd.f32 %v921_v57, %v920_v59 }
 0x49a   :  { %1608 = vmatpush3.bf16.msra.mxu0 %v1948_v10  ;;  %1620 = vmatpush3.bf16.msra.mxu1 %v1897_v1 }
 0x49b   :  { %v869_v61 = vmul.f32 1.8, %v868_v60  ;;  %v923_v62 = vmul.f32 1.8, %v922_v23  ;;  %1609 = vmatprep.subr.bf16.mxu0 %v1779_v0  ;;  %1621 = vmatprep.subr.bf16.mxu1 %v1779_v0  ;;  %v977_v41 = vmul.f32 %v2068_v22, %v868_v60  ;;  %v1031_v45 = vmul.f32 %v1977_v16, %v922_v23 }
 0x49c   :  { %1615 = vmatprep.mubr.msk.bf16.mxu0 %vm1780_vm0, %v1779_v0  ;;  %1627 = vmatprep.mubr.msk.bf16.mxu1 %vm1780_vm0, %v1779_v0 }
 0x49d   :  { %v870_v63 = vadd.f32 0.3, %v869_v61  ;;  %v924_v4 = vadd.f32 0.3, %v923_v62 }
 0x49e   :  { %1610 = vmatpush3.bf16.msra.mxu0 %v1952_v11  ;;  %1622 = vmatpush3.bf16.msra.mxu1 %v1902_v2 }
 0x49f   :  { %v873_v5 = vmul.f32 %v1352_v54, %v870_v63  ;;  %v927_v8 = vmul.f32 %v1354_v53, %v924_v4  ;;  %1611 = vmatprep.subr.bf16.mxu0 %v1779_v0  ;;  %1623 = vmatprep.subr.bf16.mxu1 %v1779_v0 }
 0x4a2   :  { %1612 = vmatpush3.bf16.msra.mxu0 %v1963_v14  ;;  %1624 = vmatpush3.bf16.msra.mxu1 %v1920_v6 }
 0x4a3   :  { %1613 = vmatprep.subr.bf16.mxu0 %v1779_v0  ;;  %1625 = vmatprep.subr.bf16.mxu1 %v1779_v0 }
 0x4a6   :  { %1614 = vmatpush3.bf16.msra.mxu0 %v1970_v15  ;;  %1626 = vmatpush3.bf16.msra.mxu1 %v1928_v7 }
 0x4a7   :  { %1631 = vmatprep.subr.bf16.mxu0 %v1779_v0  ;;  %1643 = vmatprep.subr.bf16.mxu1 %v1779_v0 }
 0x56c   :  { %v860_v9 = vpop.f32.mrb[24].mxu0  ;;  %v913_v12 = vpop.f32.mrb[20].mxu1 }
 0x56d   :  { %v861_v18 = vadd.f32 %v2088_v33, %v860_v9  ;;  %v919_v28 = vadd.f32 %v913_v12, %v193_v21  ;;  %v1593_v29 = vpop.f32.mrb[25].mxu0  ;;  %v1605_v30 = vpop.f32.mrb[21].mxu1 }
 0x56e   :  { %v863_v31 = vpop.f32.mrb[26].mxu0  ;;  %v916_v34 = vpop.f32.mrb[22].mxu1 }
 0x56f   :  { %v872_v19 = vadd.f32 %v871_v26, %v861_v18  ;;  %v926_v20 = vadd.f32 %v925_v3, %v919_v28  ;;  %v1594_v35 = vpop.f32.mrb[27].mxu0  ;;  %v1606_v36 = vpop.f32.mrb[23].mxu1 }
 0x571   :  { %v874_v13 = vsub.f32 %v872_v19, %v873_v5  ;;  %v928_v37 = vsub.f32 %v926_v20, %v927_v8 }
 0x573   :  { %v875_v51 = vsub.f32 %v874_v13, %v870_v63  ;;  %v929_v38 = vsub.f32 %v928_v37, %v924_v4  ;;  %v1036_v60 = vmul.f32 %v1998_v27, %v928_v37  ;;  %v201_v37 = vadd.f32 %v2031_v50, %v1993_v25 }
 0x575   :  { %vm876_vm12 = vcmp.gt.f32.partialorder %v875_v51, 0.0  ;;  %vm930_vm13 = vcmp.gt.f32.partialorder %v929_v38, 0.0 }
 0x576   :  { %v1358_v39 = vsel %vm930_vm13, 1.0, %v1779_v0  ;;  %v1356_v40 = vsel %vm876_vm12, 1.0, %v1779_v0 }
 0x577   :  { %v933_v42 = vpack.c.bf16 %v1358_v39, %v1358_v39  ;;  %v1032_v43 = vmul.f32 %v1358_v39, %v1982_v17  ;;  %v978_v44 = vmul.f32 %v1356_v40, %v2073_v24 }
 0x579   :  { %1616 = vmatmul.mubr.msk.bf16.vlgmr.msra.gmra.mrb[28].mxu0 %vm296_vm2, %v933_v42  ;;  %1628 = vmatmul.mubr.msk.bf16.vlgmr.msra.gmra.mrb[24].mxu1 %vm296_vm2, %v933_v42  ;;  %v979_v46 = vadd.f32 %v978_v44, %v977_v41  ;;  %v1033_v47 = vadd.f32 %v1032_v43, %v1031_v45 }
 0x57a   :  { %1632 = vmatpush3.bf16.msra.mxu0 %v1948_v10  ;;  %1644 = vmatpush3.bf16.msra.mxu1 %v1897_v1 }
 0x57b   :  { %v980_v49 = vmul.f32 1.8, %v979_v46  ;;  %v1034_v52 = vmul.f32 1.8, %v1033_v47  ;;  %1633 = vmatprep.subr.bf16.mxu0 %v1779_v0  ;;  %1645 = vmatprep.subr.bf16.mxu1 %v1779_v0  ;;  %v1088_v28 = vmul.f32 %v2068_v22, %v979_v46  ;;  %v1142_v31 = vmul.f32 %v1977_v16, %v1033_v47 }
 0x57c   :  { %1639 = vmatprep.mubr.msk.bf16.mxu0 %vm1780_vm0, %v1779_v0  ;;  %1651 = vmatprep.mubr.msk.bf16.mxu1 %vm1780_vm0, %v1779_v0 }
 0x57d   :  { %v981_v53 = vadd.f32 0.3, %v980_v49  ;;  %v1035_v54 = vadd.f32 0.3, %v1034_v52 }
 0x57e   :  { %1634 = vmatpush3.bf16.msra.mxu0 %v1952_v11  ;;  %1646 = vmatpush3.bf16.msra.mxu1 %v1902_v2  ;;  %v198_v2 = vadd.f32 %v2027_v48, %v1993_v25 }
 0x57f   :  { %v984_v55 = vmul.f32 %v1356_v40, %v981_v53  ;;  %v1038_v1 = vmul.f32 %v1358_v39, %v1035_v54  ;;  %1635 = vmatprep.subr.bf16.mxu0 %v1779_v0  ;;  %1647 = vmatprep.subr.bf16.mxu1 %v1779_v0 }
 0x582   :  { %1636 = vmatpush3.bf16.msra.mxu0 %v1963_v14  ;;  %1648 = vmatpush3.bf16.msra.mxu1 %v1920_v6  ;;  %v982_v6 = vmul.f32 %v2083_v32, %v874_v13 }
 0x583   :  { %1637 = vmatprep.subr.bf16.mxu0 %v1779_v0  ;;  %1649 = vmatprep.subr.bf16.mxu1 %v1779_v0 }
 0x586   :  { %1638 = vmatpush3.bf16.msra.mxu0 %v1970_v15  ;;  %1650 = vmatpush3.bf16.msra.mxu1 %v1928_v7 }
 0x587   :  { %1655 = vmatprep.subr.bf16.mxu0 %v1779_v0  ;;  %1667 = vmatprep.subr.bf16.mxu1 %v1779_v0 }
 0x64c   :  { %v971_v56 = vpop.f32.mrb[28].mxu0  ;;  %v1024_v57 = vpop.f32.mrb[24].mxu1 }
 0x64d   :  { %v972_v58 = vadd.f32 %v2088_v33, %v971_v56  ;;  %v1030_v59 = vadd.f32 %v1024_v57, %v198_v2  ;;  %v1617_v23 = vpop.f32.mrb[29].mxu0  ;;  %v1629_v61 = vpop.f32.mrb[25].mxu1 }
 0x64e   :  { %v974_v62 = vpop.f32.mrb[30].mxu0  ;;  %v1027_v7 = vpop.f32.mrb[26].mxu1 }
 0x64f   :  { %v983_v63 = vadd.f32 %v982_v6, %v972_v58  ;;  %v1037_v4 = vadd.f32 %v1036_v60, %v1030_v59  ;;  %v1618_v5 = vpop.f32.mrb[31].mxu0  ;;  %v1630_v8 = vpop.f32.mrb[27].mxu1  ;;  %v1700_v6 = vld [vmem:[#allocation5 + $0x8] sm:$0xff]   ;;  %v1701_v59 = vld [vmem:[#allocation5 + $0x10] sm:$0xff]   ;;  %v1702_v60 = vld [vmem:[#allocation5 + $0x18] sm:$0xff]  }
 0x651   :  { %v985_v21 = vsub.f32 %v983_v63, %v984_v55  ;;  %v1039_v9 = vsub.f32 %v1037_v4, %v1038_v1 }
 0x653   :  { %v986_v48 = vsub.f32 %v985_v21, %v981_v53  ;;  %v1040_v12 = vsub.f32 %v1039_v9, %v1035_v54  ;;  %v1093_v39 = vmul.f32 %v2083_v32, %v985_v21 }
 0x655   :  { %vm987_vm14 = vcmp.gt.f32.partialorder %v986_v48, 0.0  ;;  %vm1041_vm15 = vcmp.gt.f32.partialorder %v1040_v12, 0.0 }
 0x656   :  { %v1362_v18 = vsel %vm1041_vm15, 1.0, %v1779_v0  ;;  %v1360_v26 = vsel %vm987_vm14, 1.0, %v1779_v0 }
 0x657   :  { %v1044_v3 = vpack.c.bf16 %v1362_v18, %v1362_v18  ;;  %v1143_v29 = vmul.f32 %v1362_v18, %v1982_v17  ;;  %v1089_v30 = vmul.f32 %v1360_v26, %v2073_v24 }
 0x659   :  { %1640 = vmatmul.mubr.msk.bf16.vlgmr.msra.gmra.mrb[32].mxu0 %vm296_vm2, %v1044_v3  ;;  %1652 = vmatmul.mubr.msk.bf16.vlgmr.msra.gmra.mrb[28].mxu1 %vm296_vm2, %v1044_v3  ;;  %v1090_v34 = vadd.f32 %v1089_v30, %v1088_v28  ;;  %v1144_v19 = vadd.f32 %v1143_v29, %v1142_v31 }
 0x65a   :  { %1656 = vmatpush3.bf16.msra.mxu0 %v1948_v10  ;;  %1663 = vmatprep.mubr.msk.bf16.mxu0 %vm1780_vm0, %v1779_v0  ;;  %v1699_v10 = vld [vmem:[#allocation5] sm:$0xff]  }
 0x65b   :  { %v1091_v20 = vmul.f32 1.8, %v1090_v34  ;;  %v1145_v35 = vmul.f32 1.8, %v1144_v19  ;;  %1657 = vmatprep.subr.bf16.mxu0 %v1779_v0  ;;  %1675 = vmatprep.mubr.msk.bf16.mxu1 %vm1780_vm0, %v1779_v0 }
 0x65c   :  { %1668 = vmatpush3.bf16.msra.mxu1 %v1699_v10 }
 0x65d   :  { %v1092_v17 = vadd.f32 0.3, %v1091_v20  ;;  %v1146_v16 = vadd.f32 0.3, %v1145_v35  ;;  %1669 = vmatprep.subr.bf16.mxu1 %v1779_v0 }
 0x65e   :  { %1658 = vmatpush3.bf16.msra.mxu0 %v1952_v11 }
 0x65f   :  { %v1095_v36 = vmul.f32 %v1360_v26, %v1092_v17  ;;  %v1149_v13 = vmul.f32 %v1362_v18, %v1146_v16  ;;  %1659 = vmatprep.subr.bf16.mxu0 %v1779_v0 }
 0x660   :  { %1670 = vmatpush3.bf16.msra.mxu1 %v1700_v6 }
 0x661   :  { %1671 = vmatprep.subr.bf16.mxu1 %v1779_v0 }
 0x662   :  { %1660 = vmatpush3.bf16.msra.mxu0 %v1963_v14  ;;  %v1147_v14 = vmul.f32 %v1998_v27, %v1039_v9  ;;  %v1199_v27 = vmul.f32 %v2068_v22, %v1090_v34  ;;  %v1369_v9 = vld [vmem:[%s2291_s7] ss:$0 sm:$0xff] }
 0x663   :  { %1661 = vmatprep.subr.bf16.mxu0 %v1779_v0 }
 0x664   :  { %1672 = vmatpush3.bf16.msra.mxu1 %v1701_v59 }
 0x665   :  { %1673 = vmatprep.subr.bf16.mxu1 %v1779_v0 }
 0x666   :  { %1662 = vmatpush3.bf16.msra.mxu0 %v1970_v15 }
 0x668   :  { %1674 = vmatpush3.bf16.msra.mxu1 %v1702_v60 }
 0x72c   :  { %v1082_v51 = vpop.f32.mrb[32].mxu0  ;;  %v1135_v38 = vpop.f32.mrb[28].mxu1 }
 0x72d   :  { %v1083_v11 = vadd.f32 %v2088_v33, %v1082_v51  ;;  %v1141_v40 = vadd.f32 %v1135_v38, %v201_v37  ;;  %v1641_v41 = vpop.f32.mrb[33].mxu0  ;;  %v1653_v42 = vpop.f32.mrb[29].mxu1 }
 0x72e   :  { %v1085_v43 = vpop.f32.mrb[34].mxu0  ;;  %v1138_v15 = vpop.f32.mrb[30].mxu1 }
 0x72f   :  { %v1094_v44 = vadd.f32 %v1093_v39, %v1083_v11  ;;  %v1148_v45 = vadd.f32 %v1147_v14, %v1141_v40  ;;  %v1642_v46 = vpop.f32.mrb[35].mxu0  ;;  %v1654_v47 = vpop.f32.mrb[31].mxu1 }
 0x731   :  { %v1096_v49 = vsub.f32 %v1094_v44, %v1095_v36  ;;  %v1150_v52 = vsub.f32 %v1148_v45, %v1149_v13 }
 0x733   :  { %v1097_v25 = vsub.f32 %v1096_v49, %v1092_v17  ;;  %v1151_v50 = vsub.f32 %v1150_v52, %v1146_v16 }
 0x735   :  { %vm1098_vm0 = vcmp.gt.f32.partialorder %v1097_v25, 0.0  ;;  %vm1152_vm1 = vcmp.gt.f32.partialorder %v1151_v50, 0.0 }
 0x736   :  { %v1366_v53 = vsel %vm1152_vm1, 1.0, %v1779_v0  ;;  %v1364_v54 = vsel %vm1098_vm0, 1.0, %v1779_v0 }
 0x737   :  { %v1155_v55 = vpack.c.bf16 %v1366_v53, %v1366_v53  ;;  %v1200_v1 = vmul.f32 %v1364_v54, %v2073_v24  ;;  %v1204_v24 = vmul.f32 %v2083_v32, %v1096_v49 }
 0x739   :  { %1664 = vmatmul.mubr.msk.bf16.vlgmr.msra.gmra.mrb[36].mxu0 %vm296_vm2, %v1155_v55  ;;  %v1201_v2 = vadd.f32 %v1200_v1, %v1199_v27 }
 0x73b   :  { %v1202_v56 = vmul.f32 1.8, %v1201_v2 }
 0x73d   :  { %v1203_v57 = vadd.f32 0.3, %v1202_v56 }
 0x73f   :  { %v1206_v58 = vmul.f32 %v1364_v54, %v1203_v57 }
 0x80c   :  { %v1193_v23 = vpop.f32.mrb[36].mxu0 }
 0x80d   :  { %v1194_v22 = vadd.f32 %v2088_v33, %v1193_v23  ;;  %v1665_v61 = vpop.f32.mrb[37].mxu0 }
 0x80e   :  { %v1196_v62 = vpop.f32.mrb[38].mxu0 }
 0x80f   :  { %v1205_v7 = vadd.f32 %v1204_v24, %v1194_v22  ;;  %v1666_v63 = vpop.f32.mrb[39].mxu0 }
 0x811   :  { %v1207_v4 = vsub.f32 %v1205_v7, %v1206_v58 }
 0x813   :  { %v1208_v5 = vsub.f32 %v1207_v4, %v1203_v57 }
 0x815   :  { %vm1209_vm3 = vcmp.gt.f32.partialorder %v1208_v5, 0.0 }
 0x816   :  { %v1368_v8 = vsel %vm1209_vm3, 1.0, %v1779_v0 }
 0x817   :  { %v1221_v21 = vpack.c.bf16 %v1368_v8, %v1368_v8 }
 0x819   :  { %1676 = vmatmul.mubr.msk.bf16.vlgmr.msra.gmra.mrb[32].mxu1 %vm296_vm2, %v1221_v21 }
 0x8ec   :  { %v1289_v33 = vpop.f32.mrb[32].mxu1 }
 0x8ed   :  { %v1290_v32 = vadd.f32 %v1369_v9, %v1289_v33  ;;  %v1677_v48 = vpop.f32.mrb[33].mxu1 }
 0x8ee   :  { %v1292_v12 = vpop.f32.mrb[34].mxu1 }
 0x8ef   :  { %1295 = vst [vmem:[#allocation7] sm:$0xff] %v1290_v32  ;;  %v1678_v18 = vpop.f32.mrb[35].mxu1 }
 0x8f0   :  { %1758 = shalt.err (!%p1755_p6)
}
 0x8f1   :  { %s1759_s7 = scalar_lea.hbm %s2300_s16, 128 }
 0x8f2   :  { %p1760_p7 = scmp.ne.s32.totalorder %s2300_s16, %s1759_s7  ;;  %p1763_p8 = scmp.lt.u32.totalorder %s1759_s7, %s2300_s16 }
 0x8f4   :  { %p1765_p9 = pnand %p1763_p8, %p1760_p7 }
 0x8f6   :  { %1768 = shalt.err (!%p1765_p9)
}
 0x8f7   :  { %1305 = dma.vmem_to_hbm [thread:$0]  %s1303_s15, 128, %s2300_s16, [#allocation4]  }
 0x8f8   :  { %1773 = dma.done.wait [#allocation4], 128  }
 0x8f9   :  { %1774 = vsyncadd [#allocation4], 4294967168 }
 0x8fa   :  { %1309 = vsyncpa [#allocation3], 1 }
 0x8fb   :  { %1310 = vsyncpa [#allocation6], 1 }
 0x8fc   :  { %1311 = vsyncpa [#allocation4], 1 }

</bundles_post_ra>
